<compile_context>
chip_gen: v7x
topology: tpu7x:2x2x1
jax: 0.10.0
libtpu: 0.0.40
codegen_flags: <defaults>
</compile_context>

<pallas_src>
import math
import functools

import jax
import jax.numpy as jnp
from jax import lax
from jax.experimental import pallas as pl
from jax.experimental.pallas import tpu as pltpu

LN_EPS = 1e-5  # PyTorch nn.LayerNorm default


# --------------------------------------------------------------------------
# In-kernel helpers
# --------------------------------------------------------------------------

def _layernorm(h, g, b):
    """LayerNorm over the last axis, PyTorch semantics (biased var, eps=1e-5). f32."""
    mu = jnp.mean(h, axis=-1, keepdims=True)
    var = jnp.mean((h - mu) * (h - mu), axis=-1, keepdims=True)
    return (h - mu) * lax.rsqrt(var + LN_EPS) * g + b


# --------------------------------------------------------------------------
# Pallas kernels
# --------------------------------------------------------------------------

def _attn_block_kernel(xq_ref, xkv_ref, wq_ref, bq_ref, wk_ref, bk_ref,
                       wv_ref, bv_ref, wo_ref, bo_ref, g_ref, b_ref, o_ref):
    """o = LayerNorm(xq + O(MHA(q = xq @ Wq, kv = xkv @ Wk/Wv))).

    xq_ref:  (1, tq, D)  query tile (also the residual)
    xkv_ref: (1, S,  D)  full key/value source sequence
    wq/wk/wv: (H, D, Dh) bf16, head-major (scale folded into wq/bq)
    wo:       (H, Dh, D) bf16
    biases:   f32
    """
    xq = xq_ref[0].astype(jnp.float32)                 # (tq, D) f32 residual
    xq_b = xq.astype(jnp.bfloat16)
    xkv_b = xkv_ref[0].astype(jnp.bfloat16)            # (S, D)

    # Per-head projections via batched-free dot_general: (tq, H, Dh) / (S, H, Dh)
    q3 = lax.dot_general(xq_b, wq_ref[...], (((1,), (1,)), ((), ())),
                         preferred_element_type=jnp.float32) + bq_ref[...]
    k3 = lax.dot_general(xkv_b, wk_ref[...], (((1,), (1,)), ((), ())),
                         preferred_element_type=jnp.float32) + bk_ref[...]
    v3 = lax.dot_general(xkv_b, wv_ref[...], (((1,), (1,)), ((), ())),
                         preferred_element_type=jnp.float32) + bv_ref[...]

    # Scores: batch over heads, contract on Dh -> (H, tq, S), f32 accumulation.
    # TODO(synk): x_mask / cross_mask are None in this configuration; no
    # attention mask (e.g. causal) is applied inside the kernel.
    s = lax.dot_general(q3.astype(jnp.bfloat16), k3.astype(jnp.bfloat16),
                        (((2,), (2,)), ((1,), (1,))),
                        preferred_element_type=jnp.float32)

    m = jnp.max(s, axis=-1, keepdims=True)
    e = jnp.exp(s - m)
    p = e * pl.reciprocal(jnp.sum(e, axis=-1, keepdims=True), approx=True)

    # P @ V: (H, tq, S) x (S, H, Dh) -> (H, tq, Dh)
    pv = lax.dot_general(p.astype(jnp.bfloat16), v3.astype(jnp.bfloat16),
                         (((2,), (0,)), ((0,), (1,))),
                         preferred_element_type=jnp.float32)

    # Per-head slice of the output projection, summed over heads (no concat):
    # (H, tq, Dh) x (H, Dh, D) -> (H, tq, D) -> sum_H -> (tq, D)
    oh = lax.dot_general(pv.astype(jnp.bfloat16), wo_ref[...],
                         (((2,), (1,)), ((0,), (0,))),
                         preferred_element_type=jnp.float32)
    attn = jnp.sum(oh, axis=0) + bo_ref[...]

    y = _layernorm(xq + attn, g_ref[...], b_ref[...])
    o_ref[0] = y.astype(o_ref.dtype)


def _ffn_ln_kernel(x_ref, w1_ref, b1_ref, w2_ref, b2_ref, g_ref, b_ref, o_ref):
    """o = LayerNorm(x + conv2(relu(conv1(x))))  (kernel_size=1 conv == matmul)."""
    x = x_ref[...].astype(jnp.float32)                 # (tm, D)
    h = jnp.dot(x.astype(jnp.bfloat16), w1_ref[...],
                preferred_element_type=jnp.float32) + b1_ref[...]
    h = jnp.maximum(h, 0.0)                            # F.relu
    y = jnp.dot(h.astype(jnp.bfloat16), w2_ref[...],
                preferred_element_type=jnp.float32) + b2_ref[...]
    z = _layernorm(x + y, g_ref[...], b_ref[...])
    o_ref[...] = z.astype(o_ref.dtype)


# --------------------------------------------------------------------------
# Wrappers (pallas_call plumbing)
# --------------------------------------------------------------------------

def _vmem_limit(est_bytes):
    """Footprint-derived scoped-VMEM limit, clamped to [32 MiB, 64 MiB] (v7x budget)."""
    return int(min(max(int(est_bytes * 1.3), 32 * 1024 * 1024), 64 * 1024 * 1024))


def _pick_seq_tile(L):
    """q-tile length: largest of {128,...,8} dividing L, else the whole sequence."""
    for t in (128, 64, 32, 16, 8):
        if L % t == 0:
            return t
    return L


def _prep_attn_params(ap, n_heads, D):
    """Reshape 2-D projection weights to head-major 3-D, fold the 1/sqrt(Dh)
    scale into Wq/bq, and cast matmul weights to bf16 (biases stay f32)."""
    H = n_heads
    Dh = D // H
    scale = 1.0 / math.sqrt(Dh)

    def head_w(w):                       # (D, D) -> (H, D, Dh)
        return jnp.transpose(w.reshape(D, H, Dh), (1, 0, 2))

    def head_b(b):                       # (1, D) -> (1, H, Dh)
        return b.reshape(1, H, Dh)

    wq3 = (head_w(ap["wq"]) * scale).astype(jnp.bfloat16)
    bq3 = (head_b(ap["bq"]) * scale).astype(jnp.float32)
    wk3 = head_w(ap["wk"]).astype(jnp.bfloat16)
    bk3 = head_b(ap["bk"]).astype(jnp.float32)
    wv3 = head_w(ap["wv"]).astype(jnp.bfloat16)
    bv3 = head_b(ap["bv"]).astype(jnp.float32)
    wo3 = ap["wo"].reshape(H, Dh, D).astype(jnp.bfloat16)
    bo = ap["bo"].astype(jnp.float32)
    return wq3, bq3, wk3, bk3, wv3, bv3, wo3, bo


def attn_block(xq_src, kv_src, ap, ln_g, ln_b, n_heads):
    """Fused {projections + MHA + O-proj + residual + LayerNorm} block.

    Used for both self-attention (kv_src = xq_src) and cross-attention
    (kv_src = cross).  Grid = (batch, q_tiles), both parallel; the K/V source
    block is resident across the q-tile axis.
    """
    B, L, D = xq_src.shape
    S = kv_src.shape[1]
    H = n_heads
    Dh = D // H
    tq = _pick_seq_tile(L)

    wq3, bq3, wk3, bk3, wv3, bv3, wo3, bo = _prep_attn_params(ap, H, D)

    # Advisory cost estimate (per call).
    flops = int(B * (2 * L * D * D + 2 * 2 * S * D * D     # Q + K/V projections
                     + 2 * L * S * D + 2 * L * S * D       # scores + PV
                     + 2 * L * D * D))                      # output projection
    transcendentals = int(B * H * L * S)                    # exp
    bytes_accessed = int(B * L * D * 4 + B * S * D * 4 + B * L * D * 4
                         + 4 * D * D * 2)

    # Scoped-VMEM estimate: resident bf16 weights + double-buffered blocks +
    # f32 in-kernel intermediates (projections, scores, probs, per-head out).
    vmem_est = (4 * D * D * 2
                + 2 * 2 * tq * D * 4 + 2 * S * D * 4
                + (tq + 2 * S) * H * Dh * 4
                + 2 * H * tq * S * 4
                + H * tq * (Dh + D) * 4)

    full2 = lambda b, qi: (0, 0)
    full3 = lambda b, qi: (0, 0, 0)

    # TODO(synk): for very long S on v7x, add a kv-tile grid axis with
    # online-softmax scratch accumulators (flash-style) instead of whole-S keys.
    return pl.pallas_call(
        _attn_block_kernel,
        out_shape=jax.ShapeDtypeStruct((B, L, D), xq_src.dtype),
        grid=(B, L // tq),
        in_specs=[
            pl.BlockSpec((1, tq, D), lambda b, qi: (b, qi, 0)),   # q tile (+ residual)
            pl.BlockSpec((1, S, D), lambda b, qi: (b, 0, 0)),     # full K/V source
            pl.BlockSpec((H, D, Dh), full3),                      # wq (scaled, bf16)
            pl.BlockSpec((1, H, Dh), full3),                      # bq (scaled)
            pl.BlockSpec((H, D, Dh), full3),                      # wk
            pl.BlockSpec((1, H, Dh), full3),                      # bk
            pl.BlockSpec((H, D, Dh), full3),                      # wv
            pl.BlockSpec((1, H, Dh), full3),                      # bv
            pl.BlockSpec((H, Dh, D), full3),                      # wo
            pl.BlockSpec((1, D), full2),                          # bo
            pl.BlockSpec((1, D), full2),                          # ln gamma
            pl.BlockSpec((1, D), full2),                          # ln beta
        ],
        out_specs=pl.BlockSpec((1, tq, D), lambda b, qi: (b, qi, 0)),
        compiler_params=pltpu.CompilerParams(
            dimension_semantics=("parallel", "parallel"),
            vmem_limit_bytes=_vmem_limit(vmem_est)),
        cost_estimate=pl.CostEstimate(flops=flops,
                                      transcendentals=transcendentals,
                                      bytes_accessed=bytes_accessed),
    )(xq_src, kv_src, wq3, bq3, wk3, bk3, wv3, bv3, wo3, bo, ln_g, ln_b)


def ffn_ln_block(x, params):
    """Row-tiled per-token MLP (k=1 convs) + residual + LayerNorm3."""
    B, L, D = x.shape
    M = B * L
    d_ff = params["w1"].shape[1]

    # Row tile: 512 when there is enough work, otherwise M rounded up to a
    # multiple of 8; tail rows are zero-padded and sliced off afterwards.
    tm = 512 if M >= 512 else max(8, ((M + 7) // 8) * 8)
    n_tiles = pl.cdiv(M, tm)
    M_pad = n_tiles * tm

    x2d = x.reshape(M, D)
    if M_pad != M:
        x2d = jnp.pad(x2d, ((0, M_pad - M), (0, 0)))

    w1 = params["w1"].astype(jnp.bfloat16)
    w2 = params["w2"].astype(jnp.bfloat16)
    b1 = params["b1"].astype(jnp.float32)
    b2 = params["b2"].astype(jnp.float32)

    flops = int(2 * M * D * d_ff * 2)
    bytes_accessed = int(2 * M * D * 4 + 2 * D * d_ff * 2)
    vmem_est = (2 * D * d_ff * 2
                + 2 * 2 * tm * D * 4
                + 2 * tm * d_ff * 4
                + (d_ff + 3 * D) * 4)

    full = lambda i: (0, 0)
    out = pl.pallas_call(
        _ffn_ln_kernel,
        out_shape=jax.ShapeDtypeStruct((M_pad, D), x.dtype),
        grid=(n_tiles,),
        in_specs=[
            pl.BlockSpec((tm, D), lambda i: (i, 0)),              # x tile (+ residual)
            pl.BlockSpec((D, d_ff), full),                        # conv1 weight (k=1)
            pl.BlockSpec((1, d_ff), full),                        # conv1 bias
            pl.BlockSpec((d_ff, D), full),                        # conv2 weight (k=1)
            pl.BlockSpec((1, D), full),                           # conv2 bias
            pl.BlockSpec((1, D), full),                           # ln3 gamma
            pl.BlockSpec((1, D), full),                           # ln3 beta
        ],
        out_specs=pl.BlockSpec((tm, D), lambda i: (i, 0)),
        compiler_params=pltpu.CompilerParams(
            dimension_semantics=("parallel",),
            vmem_limit_bytes=_vmem_limit(vmem_est)),
        cost_estimate=pl.CostEstimate(flops=flops, transcendentals=0,
                                      bytes_accessed=bytes_accessed),
    )(x2d, w1, b1, w2, b2, params["ln3_g"], params["ln3_b"])
    return out[:M].reshape(B, L, D)


def decoder_layer_forward(x, cross, params, n_heads, x_mask=None, cross_mask=None):
    """Mirrors DecoderLayer.forward (dropout == identity at inference)."""
    # TODO(synk): the positional embeddings p / p_x / p_c are forwarded to (and
    # ignored by) the standard multi-head attention implemented here, so they
    # are not materialized (zero effect on the output).
    x1 = attn_block(x, x, params["self_attn"],
                    params["ln1_g"], params["ln1_b"], n_heads)      # norm1(x + SA)
    x2 = attn_block(x1, cross, params["cross_attn"],
                    params["ln2_g"], params["ln2_b"], n_heads)      # norm2(x1 + CA)
    return ffn_ln_block(x2, params)                                 # norm3(x2 + FFN)


# --------------------------------------------------------------------------
# Deterministic parameter construction
# --------------------------------------------------------------------------

def make_params(key, d_model, d_ff, dtype=jnp.float32):
    keys = jax.random.split(key, 10)
    scl = 0.05
    D = d_model

    def attn_params(k0, k1, k2, k3):
        return {
            "wq": scl * jax.random.normal(k0, (D, D), dtype),
            "bq": jnp.zeros((1, D), dtype),
            "wk": scl * jax.random.normal(k1, (D, D), dtype),
            "bk": jnp.zeros((1, D), dtype),
            "wv": scl * jax.random.normal(k2, (D, D), dtype),
            "bv": jnp.zeros((1, D), dtype),
            "wo": scl * jax.random.normal(k3, (D, D), dtype),
            "bo": jnp.zeros((1, D), dtype),
        }

    return {
        "self_attn": attn_params(keys[0], keys[1], keys[2], keys[3]),
        "cross_attn": attn_params(keys[4], keys[5], keys[6], keys[7]),
        "w1": scl * jax.random.normal(keys[8], (D, d_ff), dtype),   # conv1 (k=1)
        "b1": jnp.zeros((1, d_ff), dtype),
        "w2": scl * jax.random.normal(keys[9], (d_ff, D), dtype),   # conv2 (k=1)
        "b2": jnp.zeros((1, D), dtype),
        "ln1_g": jnp.ones((1, D), dtype), "ln1_b": jnp.zeros((1, D), dtype),
        "ln2_g": jnp.ones((1, D), dtype), "ln2_b": jnp.zeros((1, D), dtype),
        "ln3_g": jnp.ones((1, D), dtype), "ln3_b": jnp.zeros((1, D), dtype),
    }


# --------------------------------------------------------------------------
# Driver
# --------------------------------------------------------------------------

if __name__ == "__main__":
    B, L, S = 2, 8, 8
    d_model, n_heads = 32, 4
    d_ff = 4 * d_model

    root = jax.random.PRNGKey(0)
    kx, kc, kp = jax.random.split(root, 3)
    x = jax.random.normal(kx, (B, L, d_model), jnp.float32)
    cross = jax.random.normal(kc, (B, S, d_model), jnp.float32)
    params = make_params(kp, d_model, d_ff)

    fwd = jax.jit(functools.partial(decoder_layer_forward, n_heads=n_heads))
    out = fwd(x, cross, params)
    out = jax.block_until_ready(out)

    assert out.shape == (B, L, d_model)
    assert bool(jnp.isfinite(out).all())
    print("KERNEL_OK")
</pallas_src>

<mosaic_0001>
module attributes {stable_mosaic.version = 11 : i64} {
  func.func @_attn_block_kernel(%arg0: i32, %arg1: i32, %arg2: memref<1x8x32xf32, #tpu.memory_space<vmem>>, %arg3: memref<1x8x32xf32, #tpu.memory_space<vmem>>, %arg4: memref<4x32x8xbf16, #tpu.memory_space<vmem>>, %arg5: memref<1x4x8xf32, #tpu.memory_space<vmem>>, %arg6: memref<4x32x8xbf16, #tpu.memory_space<vmem>>, %arg7: memref<1x4x8xf32, #tpu.memory_space<vmem>>, %arg8: memref<4x32x8xbf16, #tpu.memory_space<vmem>>, %arg9: memref<1x4x8xf32, #tpu.memory_space<vmem>>, %arg10: memref<4x8x32xbf16, #tpu.memory_space<vmem>>, %arg11: memref<1x32xf32, #tpu.memory_space<vmem>>, %arg12: memref<1x32xf32, #tpu.memory_space<vmem>>, %arg13: memref<1x32xf32, #tpu.memory_space<vmem>>, %arg14: memref<1x8x32xf32, #tpu.memory_space<vmem>>) attributes {dimension_semantics = [#tpu.dimension_semantics<parallel>, #tpu.dimension_semantics<parallel>], iteration_bounds = array<i64: 2, 1>, scalar_prefetch = 0 : i64, scratch_operands = 0 : i64, tpu.core_type = #tpu.core_type<tc>, window_params = [{transform_indices = @transform_0, window_bounds = array<i64: 1, 8, 32>}, {transform_indices = @transform_1, window_bounds = array<i64: 1, 8, 32>}, {pipeline_mode = #tpu.pipeline_mode<synchronous>, transform_indices = @transform_2, window_bounds = array<i64: 4, 32, 8>}, {pipeline_mode = #tpu.pipeline_mode<synchronous>, transform_indices = @transform_3, window_bounds = array<i64: 1, 4, 8>}, {pipeline_mode = #tpu.pipeline_mode<synchronous>, transform_indices = @transform_4, window_bounds = array<i64: 4, 32, 8>}, {pipeline_mode = #tpu.pipeline_mode<synchronous>, transform_indices = @transform_5, window_bounds = array<i64: 1, 4, 8>}, {pipeline_mode = #tpu.pipeline_mode<synchronous>, transform_indices = @transform_6, window_bounds = array<i64: 4, 32, 8>}, {pipeline_mode = #tpu.pipeline_mode<synchronous>, transform_indices = @transform_7, window_bounds = array<i64: 1, 4, 8>}, {pipeline_mode = #tpu.pipeline_mode<synchronous>, transform_indices = @transform_8, window_bounds = array<i64: 4, 8, 32>}, {pipeline_mode = #tpu.pipeline_mode<synchronous>, transform_indices = @transform_9, window_bounds = array<i64: 1, 32>}, {pipeline_mode = #tpu.pipeline_mode<synchronous>, transform_indices = @transform_10, window_bounds = array<i64: 1, 32>}, {pipeline_mode = #tpu.pipeline_mode<synchronous>, transform_indices = @transform_11, window_bounds = array<i64: 1, 32>}, {transform_indices = @transform_12, window_bounds = array<i64: 1, 8, 32>}]} {
    %c0 = arith.constant 0 : index
    %c0_0 = arith.constant 0 : index
    %c0_1 = arith.constant 0 : index
    %0 = vector.load %arg2[%c0, %c0_0, %c0_1] : memref<1x8x32xf32, #tpu.memory_space<vmem>>, vector<1x8x32xf32>
    %1 = vector.shape_cast %0 : vector<1x8x32xf32> to vector<8x32xf32>
    %2 = arith.truncf %1 : vector<8x32xf32> to vector<8x32xbf16>
    %c0_2 = arith.constant 0 : index
    %c0_3 = arith.constant 0 : index
    %c0_4 = arith.constant 0 : index
    %3 = vector.load %arg3[%c0_2, %c0_3, %c0_4] : memref<1x8x32xf32, #tpu.memory_space<vmem>>, vector<1x8x32xf32>
    %4 = vector.shape_cast %3 : vector<1x8x32xf32> to vector<8x32xf32>
    %5 = arith.truncf %4 : vector<8x32xf32> to vector<8x32xbf16>
    %c0_5 = arith.constant 0 : index
    %c0_6 = arith.constant 0 : index
    %c0_7 = arith.constant 0 : index
    %6 = vector.load %arg4[%c0_5, %c0_6, %c0_7] : memref<4x32x8xbf16, #tpu.memory_space<vmem>>, vector<4x32x8xbf16>
    %cst = arith.constant dense<0.000000e+00> : vector<8x4x8xf32>
    %7 = tpu.matmul %2, %6, %cst {dimension_numbers = #tpu.dot_dimension_numbers<[1], [1], [0], [0, 2], [0, 0, 1, 0, 1, 2], [], []>} : vector<8x32xbf16>, vector<4x32x8xbf16>, vector<8x4x8xf32> -> vector<8x4x8xf32>
    %c0_8 = arith.constant 0 : index
    %c0_9 = arith.constant 0 : index
    %c0_10 = arith.constant 0 : index
    %8 = vector.load %arg5[%c0_8, %c0_9, %c0_10] : memref<1x4x8xf32, #tpu.memory_space<vmem>>, vector<1x4x8xf32>
    %9 = vector.broadcast %8 : vector<1x4x8xf32> to vector<8x4x8xf32>
    %10 = arith.addf %7, %9 : vector<8x4x8xf32>
    %c0_11 = arith.constant 0 : index
    %c0_12 = arith.constant 0 : index
    %c0_13 = arith.constant 0 : index
    %11 = vector.load %arg6[%c0_11, %c0_12, %c0_13] : memref<4x32x8xbf16, #tpu.memory_space<vmem>>, vector<4x32x8xbf16>
    %cst_14 = arith.constant dense<0.000000e+00> : vector<8x4x8xf32>
    %12 = tpu.matmul %5, %11, %cst_14 {dimension_numbers = #tpu.dot_dimension_numbers<[1], [1], [0], [0, 2], [0, 0, 1, 0, 1, 2], [], []>} : vector<8x32xbf16>, vector<4x32x8xbf16>, vector<8x4x8xf32> -> vector<8x4x8xf32>
    %c0_15 = arith.constant 0 : index
    %c0_16 = arith.constant 0 : index
    %c0_17 = arith.constant 0 : index
    %13 = vector.load %arg7[%c0_15, %c0_16, %c0_17] : memref<1x4x8xf32, #tpu.memory_space<vmem>>, vector<1x4x8xf32>
    %14 = vector.broadcast %13 : vector<1x4x8xf32> to vector<8x4x8xf32>
    %15 = arith.addf %12, %14 : vector<8x4x8xf32>
    %c0_18 = arith.constant 0 : index
    %c0_19 = arith.constant 0 : index
    %c0_20 = arith.constant 0 : index
    %16 = vector.load %arg8[%c0_18, %c0_19, %c0_20] : memref<4x32x8xbf16, #tpu.memory_space<vmem>>, vector<4x32x8xbf16>
    %cst_21 = arith.constant dense<0.000000e+00> : vector<8x4x8xf32>
    %17 = tpu.matmul %5, %16, %cst_21 {dimension_numbers = #tpu.dot_dimension_numbers<[1], [1], [0], [0, 2], [0, 0, 1, 0, 1, 2], [], []>} : vector<8x32xbf16>, vector<4x32x8xbf16>, vector<8x4x8xf32> -> vector<8x4x8xf32>
    %c0_22 = arith.constant 0 : index
    %c0_23 = arith.constant 0 : index
    %c0_24 = arith.constant 0 : index
    %18 = vector.load %arg9[%c0_22, %c0_23, %c0_24] : memref<1x4x8xf32, #tpu.memory_space<vmem>>, vector<1x4x8xf32>
    %19 = vector.broadcast %18 : vector<1x4x8xf32> to vector<8x4x8xf32>
    %20 = arith.addf %17, %19 : vector<8x4x8xf32>
    %21 = arith.truncf %10 : vector<8x4x8xf32> to vector<8x4x8xbf16>
    %22 = arith.truncf %15 : vector<8x4x8xf32> to vector<8x4x8xbf16>
    %cst_25 = arith.constant dense<0.000000e+00> : vector<4x8x8xf32>
    %23 = tpu.matmul %21, %22, %cst_25 {dimension_numbers = #tpu.dot_dimension_numbers<[2], [2], [0], [0], [0, 1, 0, 0, 1, 0], [1], [1]>} : vector<8x4x8xbf16>, vector<8x4x8xbf16>, vector<4x8x8xf32> -> vector<4x8x8xf32>
    %cst_26 = arith.constant dense<0xFF800000> : vector<4x8xf32>
    %24 = vector.multi_reduction <maximumf>, %23, %cst_26 [2] : vector<4x8x8xf32> to vector<4x8xf32>
    %25 = vector.shape_cast %24 : vector<4x8xf32> to vector<4x8x1xf32>
    %26 = vector.broadcast %25 : vector<4x8x1xf32> to vector<4x8x8xf32>
    %27 = arith.subf %23, %26 : vector<4x8x8xf32>
    %28 = math.exp %27 : vector<4x8x8xf32>
    %cst_27 = arith.constant dense<0.000000e+00> : vector<4x8xf32>
    %29 = vector.multi_reduction <add>, %28, %cst_27 [2] : vector<4x8x8xf32> to vector<4x8xf32>
    %30 = vector.shape_cast %29 : vector<4x8xf32> to vector<4x8x1xf32>
    %31 = tpu.reciprocal %30 {approx = true} : vector<4x8x1xf32> -> vector<4x8x1xf32>
    %32 = vector.broadcast %31 : vector<4x8x1xf32> to vector<4x8x8xf32>
    %33 = arith.mulf %28, %32 : vector<4x8x8xf32>
    %34 = arith.truncf %33 : vector<4x8x8xf32> to vector<4x8x8xbf16>
    %35 = arith.truncf %20 : vector<8x4x8xf32> to vector<8x4x8xbf16>
    %cst_28 = arith.constant dense<0.000000e+00> : vector<4x8x8xf32>
    %36 = tpu.matmul %34, %35, %cst_28 {dimension_numbers = #tpu.dot_dimension_numbers<[2], [0], [1], [2], [0, 0, 0, 1, 1, 2], [0], [1]>} : vector<4x8x8xbf16>, vector<8x4x8xbf16>, vector<4x8x8xf32> -> vector<4x8x8xf32>
    %37 = arith.truncf %36 : vector<4x8x8xf32> to vector<4x8x8xbf16>
    %c0_29 = arith.constant 0 : index
    %c0_30 = arith.constant 0 : index
    %c0_31 = arith.constant 0 : index
    %38 = vector.load %arg10[%c0_29, %c0_30, %c0_31] : memref<4x8x32xbf16, #tpu.memory_space<vmem>>, vector<4x8x32xbf16>
    %cst_32 = arith.constant dense<0.000000e+00> : vector<4x8x32xf32>
    %39 = tpu.matmul %37, %38, %cst_32 {dimension_numbers = #tpu.dot_dimension_numbers<[2], [1], [1], [2], [0, 0, 0, 1, 1, 2], [0], [0]>} : vector<4x8x8xbf16>, vector<4x8x32xbf16>, vector<4x8x32xf32> -> vector<4x8x32xf32>
    %cst_33 = arith.constant dense<0.000000e+00> : vector<8x32xf32>
    %40 = vector.multi_reduction <add>, %39, %cst_33 [0] : vector<4x8x32xf32> to vector<8x32xf32>
    %c0_34 = arith.constant 0 : index
    %c0_35 = arith.constant 0 : index
    %41 = vector.load %arg11[%c0_34, %c0_35] : memref<1x32xf32, #tpu.memory_space<vmem>>, vector<1x32xf32>
    %42 = vector.broadcast %41 : vector<1x32xf32> to vector<8x32xf32>
    %43 = arith.addf %40, %42 : vector<8x32xf32>
    %44 = arith.addf %1, %43 : vector<8x32xf32>
    %c0_36 = arith.constant 0 : index
    %c0_37 = arith.constant 0 : index
    %45 = vector.load %arg12[%c0_36, %c0_37] : memref<1x32xf32, #tpu.memory_space<vmem>>, vector<1x32xf32>
    %c0_38 = arith.constant 0 : index
    %c0_39 = arith.constant 0 : index
    %46 = vector.load %arg13[%c0_38, %c0_39] : memref<1x32xf32, #tpu.memory_space<vmem>>, vector<1x32xf32>
    %cst_40 = arith.constant dense<0.000000e+00> : vector<8xf32>
    %47 = vector.multi_reduction <add>, %44, %cst_40 [1] : vector<8x32xf32> to vector<8xf32>
    %48 = vector.shape_cast %47 : vector<8xf32> to vector<8x1xf32>
    %cst_41 = arith.constant 3.200000e+01 : f32
    %49 = vector.broadcast %cst_41 : f32 to vector<8x1xf32>
    %50 = arith.divf %48, %49 : vector<8x1xf32>
    %51 = vector.broadcast %50 : vector<8x1xf32> to vector<8x32xf32>
    %52 = arith.subf %44, %51 : vector<8x32xf32>
    %53 = vector.broadcast %50 : vector<8x1xf32> to vector<8x32xf32>
    %54 = arith.subf %44, %53 : vector<8x32xf32>
    %55 = arith.mulf %52, %54 : vector<8x32xf32>
    %cst_42 = arith.constant dense<0.000000e+00> : vector<8xf32>
    %56 = vector.multi_reduction <add>, %55, %cst_42 [1] : vector<8x32xf32> to vector<8xf32>
    %57 = vector.shape_cast %56 : vector<8xf32> to vector<8x1xf32>
    %cst_43 = arith.constant 3.200000e+01 : f32
    %58 = vector.broadcast %cst_43 : f32 to vector<8x1xf32>
    %59 = arith.divf %57, %58 : vector<8x1xf32>
    %60 = vector.broadcast %50 : vector<8x1xf32> to vector<8x32xf32>
    %61 = arith.subf %44, %60 : vector<8x32xf32>
    %cst_44 = arith.constant 9.99999974E-6 : f32
    %62 = vector.broadcast %cst_44 : f32 to vector<8x1xf32>
    %63 = arith.addf %59, %62 : vector<8x1xf32>
    %64 = math.rsqrt %63 : vector<8x1xf32>
    %65 = vector.broadcast %64 : vector<8x1xf32> to vector<8x32xf32>
    %66 = arith.mulf %61, %65 : vector<8x32xf32>
    %67 = vector.broadcast %45 : vector<1x32xf32> to vector<8x32xf32>
    %68 = arith.mulf %66, %67 : vector<8x32xf32>
    %69 = vector.broadcast %46 : vector<1x32xf32> to vector<8x32xf32>
    %70 = arith.addf %68, %69 : vector<8x32xf32>
    %c0_45 = arith.constant 0 : index
    %c0_46 = arith.constant 0 : index
    %c0_47 = arith.constant 0 : index
    %71 = vector.load %arg14[%c0_45, %c0_46, %c0_47] : memref<1x8x32xf32, #tpu.memory_space<vmem>>, vector<1x8x32xf32>
    %72 = vector.shape_cast %71 : vector<1x8x32xf32> to vector<8x32xf32>
    %73 = vector.shape_cast %70 : vector<8x32xf32> to vector<1x8x32xf32>
    tpu.vector_store %arg14[%c0_45, %c0_46, %c0_47], %73 {strides = array<i32>} : memref<1x8x32xf32, #tpu.memory_space<vmem>>, vector<1x8x32xf32>,
    return
  }
  func.func @transform_0(%arg0: i32, %arg1: i32) -> (i32, i32, i32) {
    %c0_i32 = arith.constant 0 : i32
    %c0_i32_0 = arith.constant 0 : i32
    return %arg0, %arg1, %c0_i32 : i32, i32, i32
  }
  func.func @transform_1(%arg0: i32, %arg1: i32) -> (i32, i32, i32) {
    %c0_i32 = arith.constant 0 : i32
    %c0_i32_0 = arith.constant 0 : i32
    %c0_i32_1 = arith.constant 0 : i32
    return %arg0, %c0_i32, %c0_i32_0 : i32, i32, i32
  }
  func.func @transform_2(%arg0: i32, %arg1: i32) -> (i32, i32, i32) {
    %c0_i32 = arith.constant 0 : i32
    %c0_i32_0 = arith.constant 0 : i32
    %c0_i32_1 = arith.constant 0 : i32
    %c0_i32_2 = arith.constant 0 : i32
    return %c0_i32, %c0_i32_0, %c0_i32_1 : i32, i32, i32
  }
  func.func @transform_3(%arg0: i32, %arg1: i32) -> (i32, i32, i32) {
    %c0_i32 = arith.constant 0 : i32
    %c0_i32_0 = arith.constant 0 : i32
    %c0_i32_1 = arith.constant 0 : i32
    %c0_i32_2 = arith.constant 0 : i32
    return %c0_i32, %c0_i32_0, %c0_i32_1 : i32, i32, i32
  }
  func.func @transform_4(%arg0: i32, %arg1: i32) -> (i32, i32, i32) {
    %c0_i32 = arith.constant 0 : i32
    %c0_i32_0 = arith.constant 0 : i32
    %c0_i32_1 = arith.constant 0 : i32
    %c0_i32_2 = arith.constant 0 : i32
    return %c0_i32, %c0_i32_0, %c0_i32_1 : i32, i32, i32
  }
  func.func @transform_5(%arg0: i32, %arg1: i32) -> (i32, i32, i32) {
    %c0_i32 = arith.constant 0 : i32
    %c0_i32_0 = arith.constant 0 : i32
    %c0_i32_1 = arith.constant 0 : i32
    %c0_i32_2 = arith.constant 0 : i32
    return %c0_i32, %c0_i32_0, %c0_i32_1 : i32, i32, i32
  }
  func.func @transform_6(%arg0: i32, %arg1: i32) -> (i32, i32, i32) {
    %c0_i32 = arith.constant 0 : i32
    %c0_i32_0 = arith.constant 0 : i32
    %c0_i32_1 = arith.constant 0 : i32
    %c0_i32_2 = arith.constant 0 : i32
    return %c0_i32, %c0_i32_0, %c0_i32_1 : i32, i32, i32
  }
  func.func @transform_7(%arg0: i32, %arg1: i32) -> (i32, i32, i32) {
    %c0_i32 = arith.constant 0 : i32
    %c0_i32_0 = arith.constant 0 : i32
    %c0_i32_1 = arith.constant 0 : i32
    %c0_i32_2 = arith.constant 0 : i32
    return %c0_i32, %c0_i32_0, %c0_i32_1 : i32, i32, i32
  }
  func.func @transform_8(%arg0: i32, %arg1: i32) -> (i32, i32, i32) {
    %c0_i32 = arith.constant 0 : i32
    %c0_i32_0 = arith.constant 0 : i32
    %c0_i32_1 = arith.constant 0 : i32
    %c0_i32_2 = arith.constant 0 : i32
    return %c0_i32, %c0_i32_0, %c0_i32_1 : i32, i32, i32
  }
  func.func @transform_9(%arg0: i32, %arg1: i32) -> (i32, i32) {
    %c0_i32 = arith.constant 0 : i32
    %c0_i32_0 = arith.constant 0 : i32
    %c0_i32_1 = arith.constant 0 : i32
    return %c0_i32, %c0_i32_0 : i32, i32
  }
  func.func @transform_10(%arg0: i32, %arg1: i32) -> (i32, i32) {
    %c0_i32 = arith.constant 0 : i32
    %c0_i32_0 = arith.constant 0 : i32
    %c0_i32_1 = arith.constant 0 : i32
    return %c0_i32, %c0_i32_0 : i32, i32
  }
  func.func @transform_11(%arg0: i32, %arg1: i32) -> (i32, i32) {
    %c0_i32 = arith.constant 0 : i32
    %c0_i32_0 = arith.constant 0 : i32
    %c0_i32_1 = arith.constant 0 : i32
    return %c0_i32, %c0_i32_0 : i32, i32
  }
  func.func @transform_12(%arg0: i32, %arg1: i32) -> (i32, i32, i32) {
    %c0_i32 = arith.constant 0 : i32
    %c0_i32_0 = arith.constant 0 : i32
    return %arg0, %arg1, %c0_i32 : i32, i32, i32
  }
}

module attributes {stable_mosaic.version = 11 : i64} {
  func.func @_ffn_ln_kernel(%arg0: i32, %arg1: memref<16x32xf32, #tpu.memory_space<vmem>>, %arg2: memref<32x128xbf16, #tpu.memory_space<vmem>>, %arg3: memref<1x128xf32, #tpu.memory_space<vmem>>, %arg4: memref<128x32xbf16, #tpu.memory_space<vmem>>, %arg5: memref<1x32xf32, #tpu.memory_space<vmem>>, %arg6: memref<1x32xf32, #tpu.memory_space<vmem>>, %arg7: memref<1x32xf32, #tpu.memory_space<vmem>>, %arg8: memref<16x32xf32, #tpu.memory_space<vmem>>) attributes {dimension_semantics = [#tpu.dimension_semantics<parallel>], iteration_bounds = array<i64: 1>, scalar_prefetch = 0 : i64, scratch_operands = 0 : i64, tpu.core_type = #tpu.core_type<tc>, window_params = [{transform_indices = @transform_0, window_bounds = array<i64: 16, 32>}, {pipeline_mode = #tpu.pipeline_mode<synchronous>, transform_indices = @transform_1, window_bounds = array<i64: 32, 128>}, {pipeline_mode = #tpu.pipeline_mode<synchronous>, transform_indices = @transform_2, window_bounds = array<i64: 1, 128>}, {pipeline_mode = #tpu.pipeline_mode<synchronous>, transform_indices = @transform_3, window_bounds = array<i64: 128, 32>}, {pipeline_mode = #tpu.pipeline_mode<synchronous>, transform_indices = @transform_4, window_bounds = array<i64: 1, 32>}, {pipeline_mode = #tpu.pipeline_mode<synchronous>, transform_indices = @transform_5, window_bounds = array<i64: 1, 32>}, {pipeline_mode = #tpu.pipeline_mode<synchronous>, transform_indices = @transform_6, window_bounds = array<i64: 1, 32>}, {transform_indices = @transform_7, window_bounds = array<i64: 16, 32>}]} {
    %c0 = arith.constant 0 : index
    %c0_0 = arith.constant 0 : index
    %0 = vector.load %arg1[%c0, %c0_0] : memref<16x32xf32, #tpu.memory_space<vmem>>, vector<16x32xf32>
    %1 = arith.truncf %0 : vector<16x32xf32> to vector<16x32xbf16>
    %c0_1 = arith.constant 0 : index
    %c0_2 = arith.constant 0 : index
    %2 = vector.load %arg2[%c0_1, %c0_2] : memref<32x128xbf16, #tpu.memory_space<vmem>>, vector<32x128xbf16>
    %cst = arith.constant dense<0.000000e+00> : vector<16x128xf32>
    %3 = tpu.matmul %1, %2, %cst {dimension_numbers = #tpu.dot_dimension_numbers<[1], [0], [0], [1], [0, 0, 1, 1], [], []>} : vector<16x32xbf16>, vector<32x128xbf16>, vector<16x128xf32> -> vector<16x128xf32>
    %c0_3 = arith.constant 0 : index
    %c0_4 = arith.constant 0 : index
    %4 = vector.load %arg3[%c0_3, %c0_4] : memref<1x128xf32, #tpu.memory_space<vmem>>, vector<1x128xf32>
    %5 = vector.broadcast %4 : vector<1x128xf32> to vector<16x128xf32>
    %6 = arith.addf %3, %5 : vector<16x128xf32>
    %cst_5 = arith.constant 0.000000e+00 : f32
    %7 = vector.broadcast %cst_5 : f32 to vector<16x128xf32>
    %8 = arith.maximumf %6, %7 : vector<16x128xf32>
    %9 = arith.truncf %8 : vector<16x128xf32> to vector<16x128xbf16>
    %c0_6 = arith.constant 0 : index
    %c0_7 = arith.constant 0 : index
    %10 = vector.load %arg4[%c0_6, %c0_7] : memref<128x32xbf16, #tpu.memory_space<vmem>>, vector<128x32xbf16>
    %cst_8 = arith.constant dense<0.000000e+00> : vector<16x32xf32>
    %11 = tpu.matmul %9, %10, %cst_8 {dimension_numbers = #tpu.dot_dimension_numbers<[1], [0], [0], [1], [0, 0, 1, 1], [], []>} : vector<16x128xbf16>, vector<128x32xbf16>, vector<16x32xf32> -> vector<16x32xf32>
    %c0_9 = arith.constant 0 : index
    %c0_10 = arith.constant 0 : index
    %12 = vector.load %arg5[%c0_9, %c0_10] : memref<1x32xf32, #tpu.memory_space<vmem>>, vector<1x32xf32>
    %13 = vector.broadcast %12 : vector<1x32xf32> to vector<16x32xf32>
    %14 = arith.addf %11, %13 : vector<16x32xf32>
    %15 = arith.addf %0, %14 : vector<16x32xf32>
    %c0_11 = arith.constant 0 : index
    %c0_12 = arith.constant 0 : index
    %16 = vector.load %arg6[%c0_11, %c0_12] : memref<1x32xf32, #tpu.memory_space<vmem>>, vector<1x32xf32>
    %c0_13 = arith.constant 0 : index
    %c0_14 = arith.constant 0 : index
    %17 = vector.load %arg7[%c0_13, %c0_14] : memref<1x32xf32, #tpu.memory_space<vmem>>, vector<1x32xf32>
    %cst_15 = arith.constant dense<0.000000e+00> : vector<16xf32>
    %18 = vector.multi_reduction <add>, %15, %cst_15 [1] : vector<16x32xf32> to vector<16xf32>
    %19 = vector.shape_cast %18 : vector<16xf32> to vector<16x1xf32>
    %cst_16 = arith.constant 3.200000e+01 : f32
    %20 = vector.broadcast %cst_16 : f32 to vector<16x1xf32>
    %21 = arith.divf %19, %20 : vector<16x1xf32>
    %22 = vector.broadcast %21 : vector<16x1xf32> to vector<16x32xf32>
    %23 = arith.subf %15, %22 : vector<16x32xf32>
    %24 = vector.broadcast %21 : vector<16x1xf32> to vector<16x32xf32>
    %25 = arith.subf %15, %24 : vector<16x32xf32>
    %26 = arith.mulf %23, %25 : vector<16x32xf32>
    %cst_17 = arith.constant dense<0.000000e+00> : vector<16xf32>
    %27 = vector.multi_reduction <add>, %26, %cst_17 [1] : vector<16x32xf32> to vector<16xf32>
    %28 = vector.shape_cast %27 : vector<16xf32> to vector<16x1xf32>
    %cst_18 = arith.constant 3.200000e+01 : f32
    %29 = vector.broadcast %cst_18 : f32 to vector<16x1xf32>
    %30 = arith.divf %28, %29 : vector<16x1xf32>
    %31 = vector.broadcast %21 : vector<16x1xf32> to vector<16x32xf32>
    %32 = arith.subf %15, %31 : vector<16x32xf32>
    %cst_19 = arith.constant 9.99999974E-6 : f32
    %33 = vector.broadcast %cst_19 : f32 to vector<16x1xf32>
    %34 = arith.addf %30, %33 : vector<16x1xf32>
    %35 = math.rsqrt %34 : vector<16x1xf32>
    %36 = vector.broadcast %35 : vector<16x1xf32> to vector<16x32xf32>
    %37 = arith.mulf %32, %36 : vector<16x32xf32>
    %38 = vector.broadcast %16 : vector<1x32xf32> to vector<16x32xf32>
    %39 = arith.mulf %37, %38 : vector<16x32xf32>
    %40 = vector.broadcast %17 : vector<1x32xf32> to vector<16x32xf32>
    %41 = arith.addf %39, %40 : vector<16x32xf32>
    %c0_20 = arith.constant 0 : index
    %c0_21 = arith.constant 0 : index
    %42 = vector.load %arg8[%c0_20, %c0_21] : memref<16x32xf32, #tpu.memory_space<vmem>>, vector<16x32xf32>
    tpu.vector_store %arg8[%c0_20, %c0_21], %41 {strides = array<i32>} : memref<16x32xf32, #tpu.memory_space<vmem>>, vector<16x32xf32>,
    return
  }
  func.func @transform_0(%arg0: i32) -> (i32, i32) {
    %c0_i32 = arith.constant 0 : i32
    %c0_i32_0 = arith.constant 0 : i32
    return %arg0, %c0_i32 : i32, i32
  }
  func.func @transform_1(%arg0: i32) -> (i32, i32) {
    %c0_i32 = arith.constant 0 : i32
    %c0_i32_0 = arith.constant 0 : i32
    %c0_i32_1 = arith.constant 0 : i32
    return %c0_i32, %c0_i32_0 : i32, i32
  }
  func.func @transform_2(%arg0: i32) -> (i32, i32) {
    %c0_i32 = arith.constant 0 : i32
    %c0_i32_0 = arith.constant 0 : i32
    %c0_i32_1 = arith.constant 0 : i32
    return %c0_i32, %c0_i32_0 : i32, i32
  }
  func.func @transform_3(%arg0: i32) -> (i32, i32) {
    %c0_i32 = arith.constant 0 : i32
    %c0_i32_0 = arith.constant 0 : i32
    %c0_i32_1 = arith.constant 0 : i32
    return %c0_i32, %c0_i32_0 : i32, i32
  }
  func.func @transform_4(%arg0: i32) -> (i32, i32) {
    %c0_i32 = arith.constant 0 : i32
    %c0_i32_0 = arith.constant 0 : i32
    %c0_i32_1 = arith.constant 0 : i32
    return %c0_i32, %c0_i32_0 : i32, i32
  }
  func.func @transform_5(%arg0: i32) -> (i32, i32) {
    %c0_i32 = arith.constant 0 : i32
    %c0_i32_0 = arith.constant 0 : i32
    %c0_i32_1 = arith.constant 0 : i32
    return %c0_i32, %c0_i32_0 : i32, i32
  }
  func.func @transform_6(%arg0: i32) -> (i32, i32) {
    %c0_i32 = arith.constant 0 : i32
    %c0_i32_0 = arith.constant 0 : i32
    %c0_i32_1 = arith.constant 0 : i32
    return %c0_i32, %c0_i32_0 : i32, i32
  }
  func.func @transform_7(%arg0: i32) -> (i32, i32) {
    %c0_i32 = arith.constant 0 : i32
    %c0_i32_0 = arith.constant 0 : i32
    return %arg0, %c0_i32 : i32, i32
  }
}

</mosaic_0001>

<bundles_post_ra>
// kernel: decoder_layer_forward.5
= control target key start
LH: loop header
LB: loop body
LE: loop exit
PB: predicated region body
PF: predicated region fallthrough
CT: control target
= control target key end

     0   :  { %v377_v1 = vmov 0.0   ;;  %vm378_vm0 = vmmov 0   ;;  %vm54_vm1 = vcmask 261120   ;;  %s489_s0 = inlined_call_operand.vmem [shape: f32[16,32], index: 0, kind: input, shape index: {}]   ;;  %s490_s1 = inlined_call_operand.vmem [shape: bf16[32,128], index: 1, kind: input, shape index: {}]   ;;  %s491_s2 = inlined_call_operand.vmem [shape: f32[1,128], index: 2, kind: input, shape index: {}]   ;;  %s492_s3 = inlined_call_operand.vmem [shape: bf16[128,32], index: 3, kind: input, shape index: {}]   ;;  %s493_s4 = inlined_call_operand.vmem [shape: f32[1,32], index: 4, kind: input, shape index: {}]   ;;  %s494_s5 = inlined_call_operand.vmem [shape: f32[1,32], index: 5, kind: input, shape index: {}]   ;;  %s495_s6 = inlined_call_operand.vmem [shape: f32[1,32], index: 6, kind: input, shape index: {}]   ;;  %s496_s7 = inlined_call_operand.hbm [shape: f32[16,32], index: 7, kind: output, shape index: {}]  }
   0x1   :  { %v339_v0 = vld [vmem:[%s490_s1] sm:$0xff]   ;;  %306 = vmatprep.subr.bf16.mxu0 %v377_v1  ;;  %v340_v2 = vld [vmem:[%s490_s1 + $0x8] sm:$0xff]   ;;  %314 = vmatprep.subr.bf16.mxu1 %v377_v1  ;;  %v343_v8 = vld [vmem:[%s492_s3 + $0x10] sm:$0xff]  }
   0x2   :  { %307 = vmatpush3.bf16.msra.mxu0 %v339_v0  ;;  %310 = vmatprep.mubr.msk.bf16.mxu0 %vm378_vm0, %v377_v1  ;;  %v28_v3 = vld [vmem:[%s489_s0] sm:$0xff]  ;;  %v29_v4 = vld [vmem:[%s489_s0 + $0x8] sm:$0xff] }
   0x3   :  { %308 = vmatprep.subr.bf16.mxu0 %v377_v1  ;;  %v341_v5 = vld [vmem:[%s492_s3] sm:$0xff]   ;;  %330 = vmatprep.mubr.msk.bf16.mxu1 %vm378_vm0, %v377_v1  ;;  %v30_v6 = vpack.c.bf16 %v29_v4, %v28_v3  ;;  %v342_v7 = vld [vmem:[%s492_s3 + $0x8] sm:$0xff]  }
   0x4   :  { %315 = vmatpush3.bf16.msra.mxu1 %v341_v5 }
   0x5   :  { %316 = vmatprep.subr.bf16.mxu1 %v377_v1 }
   0x6   :  { %309 = vmatpush3.bf16.msra.mxu0 %v340_v2 }
   0x8   :  { %317 = vmatpush3.bf16.msra.mxu1 %v342_v7 }
   0x9   :  { %311 = vmatmul.mubr.msk.bf16.vlgmr.msra.gmra.mrb[0].mxu0 %vm54_vm1, %v30_v6  ;;  %318 = vmatprep.subr.bf16.mxu1 %v377_v1 }
   0xa   :  { %12 = vsyncpa [#allocation3], 0  ;;  %v344_v9 = vld [vmem:[%s492_s3 + $0x18] sm:$0xff]   ;;  %v345_v10 = vld [vmem:[%s492_s3 + $0x20] sm:$0xff]   ;;  %s379_s28 = smov [#allocation2]  }
   0xb   :  { %v346_v11 = vld [vmem:[%s492_s3 + $0x28] sm:$0xff]   ;;  %v347_v12 = vld [vmem:[%s492_s3 + $0x30] sm:$0xff]   ;;  %v348_v13 = vld [vmem:[%s492_s3 + $0x38] sm:$0xff]   ;;  %s268_s29 = sshll.u32 %s379_s28, 4  ;;  %s269_s29 = int_to_ptr.vmem [resolvable:$true] %s268_s29 }
   0xc   :  { %319 = vmatpush3.bf16.msra.mxu1 %v343_v8  ;;  %v279_v14 = vld [vmem:[%s491_s2] ss:$0 sm:$0xff]  ;;  %s353_s30 = scalar_lea.vmem %s269_s29, 256  ;;  %p358_p1 = scmp.lt.s32.totalorder %s269_s29, %s269_s29 }
   0xd   :  { %320 = vmatprep.subr.bf16.mxu1 %v377_v1  ;;  %v283_v24 = vld [vmem:[%s493_s4] ss:$0 sm:$0xff]  ;;  %p354_p0 = scmp.ne.s32.totalorder %s269_s29, %s353_s30  ;;  %p359_p2 = scmp.lt.s32.totalorder %s353_s30, %s353_s30 }
   0xe   :  { %v292_v52 = vld [vmem:[%s494_s5] ss:$0 sm:$0xff] }
   0xf   :  { %v293_v54 = vld [vmem:[%s495_s6] ss:$0 sm:$0xff]  ;;  %p360_p3 = por %p359_p2, %p358_p1 }
  0x10   :  { %321 = vmatpush3.bf16.msra.mxu1 %v344_v9 }
  0x11   :  { %322 = vmatprep.subr.bf16.mxu1 %v377_v1  ;;  %p361_p4 = pnand %p360_p3, %p354_p0 }
  0x14   :  { %323 = vmatpush3.bf16.msra.mxu1 %v345_v10 }
  0x15   :  { %324 = vmatprep.subr.bf16.mxu1 %v377_v1 }
  0x18   :  { %325 = vmatpush3.bf16.msra.mxu1 %v346_v11 }
  0x19   :  { %326 = vmatprep.subr.bf16.mxu1 %v377_v1 }
  0x1c   :  { %327 = vmatpush3.bf16.msra.mxu1 %v347_v12 }
  0x1d   :  { %328 = vmatprep.subr.bf16.mxu1 %v377_v1 }
  0x20   :  { %329 = vmatpush3.bf16.msra.mxu1 %v348_v13 }
  0xdc   :  { %v92_v15 = vpop.f32.mrb[0].mxu0 }
  0xdd   :  { %v93_v16 = vadd.f32 %v279_v14, %v92_v15  ;;  %v312_v17 = vpop.f32.mrb[1].mxu0 }
  0xde   :  { %v95_v18 = vpop.f32.mrb[2].mxu0 }
  0xdf   :  { %v96_v19 = vadd.f32 %v279_v14, %v95_v18  ;;  %v313_v20 = vpop.f32.mrb[3].mxu0  ;;  %v99_v21 = vmax.f32 %v93_v16, 0.0 }
  0xe1   :  { %v100_v22 = vmax.f32 %v96_v19, 0.0 }
  0xe3   :  { %v101_v23 = vpack.c.bf16 %v100_v22, %v99_v21 }
  0xe5   :  { %331 = vmatmul.mubr.bf16.vlgmr.msra.gmra.mrb[0].mxu1 %v101_v23 }
 0x1b8   :  { %v207_v25 = vpop.f32.mrb[0].mxu1 }
 0x1b9   :  { %v208_v26 = vadd.f32 %v283_v24, %v207_v25  ;;  %v332_v27 = vpop.f32.mrb[1].mxu1 }
 0x1ba   :  { %v210_v28 = vpop.f32.mrb[2].mxu1 }
 0x1bb   :  { %v211_v29 = vadd.f32 %v283_v24, %v210_v28  ;;  %v333_v30 = vpop.f32.mrb[3].mxu1  ;;  %v214_v31 = vadd.f32 %v208_v26, %v28_v3 }
 0x1bd   :  { %v218_v32 = vsel %vm54_vm1, %v214_v31, 0.0  ;;  %v215_v33 = vadd.f32 %v211_v29, %v29_v4 }
 0x1be   :  { %219 = vadd.xlane.f32.xlu0 %v218_v32 }
 0x1bf   :  { %v221_v34 = vsel %vm54_vm1, %v215_v33, 0.0 }
 0x1c2   :  { %222 = vadd.xlane.f32.xlu0 %v221_v34 }
 0x24b   :  { %v220_v35 = vpop.xlane.xlu0 %219 }
 0x24c   :  { %v225_v36 = vmul.f32 0.03125, %v220_v35 }
 0x24e   :  { %v227_v37 = vsub.f32 %v214_v31, %v225_v36 }
 0x24f   :  { %v223_v38 = vpop.xlane.xlu0 %222 }
 0x250   :  { %v226_v39 = vmul.f32 0.03125, %v223_v38  ;;  %v229_v40 = vmul.f32 %v227_v37, %v227_v37 }
 0x252   :  { %v228_v41 = vsub.f32 %v215_v33, %v226_v39  ;;  %v231_v42 = vsel %vm54_vm1, %v229_v40, 0.0 }
 0x253   :  { %232 = vadd.xlane.f32.xlu1 %v231_v42 }
 0x254   :  { %v230_v43 = vmul.f32 %v228_v41, %v228_v41 }
 0x256   :  { %v234_v44 = vsel %vm54_vm1, %v230_v43, 0.0 }
 0x257   :  { %235 = vadd.xlane.f32.xlu1 %v234_v44 }
 0x2e0   :  { %v233_v45 = vpop.xlane.xlu1 %232 }
 0x2e1   :  { %v237_v46 = vmul.f32 0.03125, %v233_v45 }
 0x2e3   :  { %v239_v47 = vadd.f32 1e-05, %v237_v46 }
 0x2e4   :  { %v236_v48 = vpop.xlane.xlu1 %235 }
 0x2e5   :  { %349 = vrsqrt.f32 %v239_v47  ;;  %v238_v49 = vmul.f32 0.03125, %v236_v48 }
 0x2e7   :  { %v240_v50 = vadd.f32 1e-05, %v238_v49 }
 0x2e9   :  { %351 = vrsqrt.f32 %v240_v50 }
 0x2ef   :  { %v350_v51 = vpop.eup %349 }
 0x2f0   :  { %v243_v53 = vmul.f32 %v350_v51, %v227_v37 }
 0x2f2   :  { %v251_v55 = vmul.f32 %v292_v52, %v243_v53 }
 0x2f3   :  { %v352_v56 = vpop.eup %351 }
 0x2f4   :  { %v244_v57 = vmul.f32 %v352_v56, %v228_v41  ;;  %v259_v58 = vadd.f32 %v293_v54, %v251_v55 }
 0x2f6   :  { %v252_v59 = vmul.f32 %v292_v52, %v244_v57  ;;  %261 = vst.msk [vmem:[#allocation2] sm:$0xff] %vm54_vm1, %v259_v58 }
 0x2f8   :  { %v260_v60 = vadd.f32 %v293_v54, %v252_v59 }
 0x2fa   :  { %262 = vst.msk [vmem:[#allocation2 + $0x8] sm:$0xff] %vm54_vm1, %v260_v60 }
 0x2fb   :  { %364 = shalt.err (!%p361_p4)
}
 0x2fc   :  { %s365_s8 = scalar_lea.hbm %s496_s7, 256 }
 0x2fd   :  { %p366_p5 = scmp.ne.s32.totalorder %s496_s7, %s365_s8  ;;  %p369_p6 = scmp.lt.u32.totalorder %s365_s8, %s496_s7 }
 0x2ff   :  { %p371_p7 = pnand %p369_p6, %p366_p5 }
 0x301   :  { %374 = shalt.err (!%p371_p7)
}
 0x302   :  { %s380_s12 = smov 128   ;;  %s381_s13 = smov 8  }
 0x303   :  { %274 = dma.vmem_to_hbm [thread:$0]  %s269_s29, 256, %s496_s7, [#allocation3], %s380_s12, %s380_s12, %s381_s13  }
 0x304   :  { %375 = dma.done.wait [#allocation3], 256  }
 0x305   :  { %376 = vsyncadd [#allocation3], 4294967040 }
 0x306   :  { %278 = vsyncpa [#allocation3], 1 }

// kernel: decoder_layer_forward.3
= control target key start
LH: loop header
LB: loop body
LE: loop exit
PB: predicated region body
PF: predicated region fallthrough
CT: control target
= control target key end

     0   :  { %s4544_s21 = smov 0   ;;  %s4546_s22 = smov 0   ;;  %s5350_s0 = inlined_call_operand.vmem [shape: f32[2,8,32], index: 0, kind: input, shape index: {}, may-alias: {0,1}]   ;;  %s5351_s1 = inlined_call_operand.vmem [shape: f32[2,8,32], index: 1, kind: input, shape index: {}, may-alias: {0,1}]   ;;  %s5352_s2 = inlined_call_operand.vmem [shape: bf16[4,32,8], index: 2, kind: input, shape index: {}]   ;;  %s5353_s3 = inlined_call_operand.vmem [shape: f32[1,4,8], index: 3, kind: input, shape index: {}]   ;;  %s5354_s4 = inlined_call_operand.vmem [shape: bf16[4,32,8], index: 4, kind: input, shape index: {}]   ;;  %s5355_s5 = inlined_call_operand.vmem [shape: f32[1,4,8], index: 5, kind: input, shape index: {}]   ;;  %s5356_s6 = inlined_call_operand.vmem [shape: bf16[4,32,8], index: 6, kind: input, shape index: {}]   ;;  %s5357_s7 = inlined_call_operand.vmem [shape: f32[1,4,8], index: 7, kind: input, shape index: {}]   ;;  %s5358_s8 = inlined_call_operand.vmem [shape: bf16[4,8,32], index: 8, kind: input, shape index: {}]   ;;  %s5359_s9 = inlined_call_operand.vmem [shape: f32[1,32], index: 9, kind: input, shape index: {}]   ;;  %s5360_s10 = inlined_call_operand.vmem [shape: f32[1,32], index: 10, kind: input, shape index: {}]   ;;  %s5361_s11 = inlined_call_operand.vmem [shape: f32[1,32], index: 11, kind: input, shape index: {}]   ;;  %s5362_s12 = inlined_call_operand.vmem [shape: f32[2,8,32], index: 12, kind: output, shape index: {}]  }
   0x1   :  { %5372 = sst [smem:[#allocation2_spill]] %s5350_s0  ;;  %s4548_s23 = smov 0  }
   0x2 LB: > { %s34_s24 = sadd.s32 1, %s4462_s22  ;;  %p4178_p0 = scmp.ge.s32.totalorder %s4466_s23, 1  ;;  %s4466_s23 = sphi %s4548_s23, %s22_s23   ;;  %s4462_s22 = sphi %s4546_s22, %s5381_s22   ;;  %s4458_s21 = sphi %s4544_s21, %s5380_s21  }
   0x3   : > { %p36_p1 = scmp.ge.s32.totalorder %s34_s24, 2  ;;  %p389_p2 = scmp.lt.s32.totalorder %s4466_s23, 3 }
   0x5   : > { %s5383_s24 = smov (%p36_p1, %s34_s24), 0  ;;  %p390_p3 = pnand %p4178_p0, %p389_p2 }
   0x6   : > { %v531_v0 = vlaneseq (!%p390_p3)  ;;  %v4468_v1 = vmov (!%p390_p3), 1983009808   ;;  %v4469_v3 = vmov (!%p390_p3), 1934713408   ;;  %v1267_v5 = vld [vmem:[%s5354_s4] sm:$0xf] (!%p390_p3) }
   0x7   : > { %393 = sbr.rel (%p390_p3) target bundleno = 2152 (0x868), region = 68  ;;  %v529_v2 = vunpack.c.l.s4 (!%p390_p3), %v4468_v1  ;;  %v546_v4 = vunpack.c.l.s4 (!%p390_p3), %v4469_v3  ;;  %v1268_v6 = vld [vmem:[%s5354_s4 + $0x4] sm:$0xf] (!%p390_p3)  ;;  %v1271_v7 = vld [vmem:[%s5354_s4 + $0x10] sm:$0xf] (!%p390_p3)  ;;  %v1287_v11 = vshrl.u32 (!%p390_p3), %v1267_v5, 16 }
   0x8   : > { %v532_v8 = vshrl.u32 (!%p390_p3), %v531_v0, 7  ;;  %v1272_v9 = vld [vmem:[%s5354_s4 + $0x14] sm:$0xf] (!%p390_p3)  ;;  %v1275_v10 = vld [vmem:[%s5354_s4 + $0x20] sm:$0xf] (!%p390_p3)  ;;  %v1286_v16 = vpack.i.b16 (!%p390_p3), %v1271_v7, %v1267_v5  ;;  %v1288_v19 = vshrl.u32 (!%p390_p3), %v1271_v7, 16 }
   0x9   : > { %v530_v12 = vunpack.c.0.s8 (!%p390_p3), %v529_v2  ;;  %v547_v13 = vunpack.c.0.s8 (!%p390_p3), %v546_v4  ;;  %v1276_v14 = vld [vmem:[%s5354_s4 + $0x24] sm:$0xf] (!%p390_p3)  ;;  %v1279_v15 = vld [vmem:[%s5354_s4 + $0x30] sm:$0xf] (!%p390_p3)  ;;  %v1298_v17 = vpack.i.b16 (!%p390_p3), %v1272_v9, %v1268_v6  ;;  %v1280_v18 = vld [vmem:[%s5354_s4 + $0x34] sm:$0xf] (!%p390_p3) }
   0xa   : > { %v1292_v20 = vpack.i.b16 (!%p390_p3), %v1279_v15, %v1275_v10  ;;  %v1293_v21 = vshrl.u32 (!%p390_p3), %v1275_v10, 16  ;;  %v1294_v22 = vshrl.u32 (!%p390_p3), %v1279_v15, 16  ;;  %v1299_v25 = vshrl.u32 (!%p390_p3), %v1268_v6, 16  ;;  %v4602_v47 = vld [vmem:[%s5354_s4 + $0x8] sm:$0xf] (!%p390_p3)  ;;  %s5369_s29 = smov (!%p390_p3), 8  }
   0xb   : > { %v4588_v23 = vsub.s32 (!%p390_p3), %v530_v12, %v532_v8  ;;  %v4590_v24 = vsub.s32 (!%p390_p3), %v547_v13, %v532_v8  ;;  %v1300_v26 = vshrl.u32 (!%p390_p3), %v1272_v9, 16  ;;  %v1289_v27 = vpack.i.b16 (!%p390_p3), %v1288_v19, %v1287_v11  ;;  %v1273_v48 = vld [vmem:[%s5354_s4 + $0x18] sm:$0xf] (!%p390_p3)  ;;  %v1277_v9 = vld [vmem:[%s5354_s4 + $0x28] sm:$0xf] (!%p390_p3)  ;;  %s5365_s30 = smov (!%p390_p3), 16  }
   0xc   : > { %v1295_v28 = vpack.i.b16 (!%p390_p3), %v1294_v22, %v1293_v21  ;;  %v1304_v29 = vpack.i.b16 (!%p390_p3), %v1280_v18, %v1276_v14  ;;  %v1305_v30 = vshrl.u32 (!%p390_p3), %v1276_v14, 16  ;;  %v1306_v32 = vshrl.u32 (!%p390_p3), %v1280_v18, 16  ;;  %v1281_v13 = vld [vmem:[%s5354_s4 + $0x38] sm:$0xf] (!%p390_p3)  ;;  %s5363_s17 = smov (!%p390_p3), 24   ;;  %p439_p4 = scmp.lt.s32.totalorder (!%p390_p3), %s4458_s21, 1 }
   0xd   : > { %v1301_v31 = vpack.i.b16 (!%p390_p3), %v1300_v26, %v1299_v25  ;;  %v1339_v33 = vrot.slane (!%p390_p3), %v1286_v16, %v4588_v23  ;;  %v1347_v34 = vrot.slane (!%p390_p3), %v1292_v20, %v4588_v23  ;;  %v1373_v35 = vrot.slane (!%p390_p3), %v1289_v27, %v4588_v23  ;;  %v1274_v25 = vld [vmem:[%s5354_s4 + $0x1c] sm:$0xf] (!%p390_p3)  ;;  %s5373_s0 = sld [smem:[#allocation2_spill]] (!%p390_p3)  ;;  %s5367_s28 = smov (!%p390_p3), 112  }
   0xe   : > { %v1381_v36 = vrot.slane %v1295_v28, %v4588_v23  ;;  %v1407_v37 = vrot.slane %v1298_v17, %v4588_v23  ;;  %v1415_v38 = vrot.slane %v1304_v29, %v4588_v23  ;;  %v1307_v39 = vpack.i.b16 %v1306_v32, %v1305_v30  ;;  %v1270_v17 = vld [vmem:[%s5354_s4 + $0xc] sm:$0xf]  ;;  %v1282_v30 = vld [vmem:[%s5354_s4 + $0x3c] sm:$0xf]  ;;  %s5385_s21 = smov (!%p439_p4, %s4458_s21), 1  ;;  %s5368_s14 = smov 120  }
   0xf   : > { %v1348_v40 = vcombine.low %v1339_v33, %v1347_v34  ;;  %v1349_v41 = vcombine.high %v1339_v33, %v1347_v34  ;;  %v1441_v42 = vrot.slane %v1301_v31, %v4588_v23  ;;  %v1310_v52 = vpack.i.b16 %v1273_v48, %v4602_v47  ;;  %v1278_v29 = vld [vmem:[%s5354_s4 + $0x2c] sm:$0xf]  ;;  %s4873_s13 = sshll.u32 %s5385_s21, 3  ;;  %s5371_s15 = smov 104  }
  0x10   : > { %v1382_v43 = vcombine.low %v1373_v35, %v1381_v36  ;;  %v1383_v44 = vcombine.high %v1373_v35, %v1381_v36  ;;  %v1416_v45 = vcombine.low %v1407_v37, %v1415_v38  ;;  %v1417_v46 = vcombine.high %v1407_v37, %v1415_v38  ;;  %s449_s16 = scalar_lea.vmem %s5351_s1, %s4873_s13  ;;  %s5375_s21 = smov 24  }
  0x11   : > { %v1356_v49 = vrot.slane %v1348_v40, %v4590_v24  ;;  %v1363_v50 = vrot.slane %v1349_v41, %v4590_v24  ;;  %v1449_v51 = vrot.slane %v1307_v39, %v4588_v23  ;;  %v1311_v14 = vshrl.u32 %v4602_v47, 16  ;;  %s456_s27 = scalar_lea.vmem %s5362_s12, %s4873_s13 }
  0x12   : > { %v1390_v53 = vrot.slane %v1382_v43, %v4590_v24  ;;  %v1397_v54 = vrot.slane %v1383_v44, %v4590_v24  ;;  %v1424_v55 = vrot.slane %v1416_v45, %v4590_v24  ;;  %v1431_v56 = vrot.slane %v1417_v46, %v4590_v24 }
  0x13   : > { %v1450_v57 = vcombine.low %v1441_v42, %v1449_v51  ;;  %v1451_v58 = vcombine.high %v1441_v42, %v1449_v51  ;;  %v1604_v59 = vcombine.low %v1356_v49, %v1363_v50  ;;  %v4199_v60 = vcombine.high %v1356_v49, %v1363_v50  ;;  %s4903_s19 = scalar_lea.vmem %s5373_s0, %s4873_s13  ;;  %s5376_s0 = smov 8  }
  0x14   : > { %v1629_v61 = vcombine.low %v1390_v53, %v1397_v54  ;;  %v4200_v62 = vcombine.high %v1390_v53, %v1397_v54  ;;  %v1654_v63 = vcombine.low %v1424_v55, %v1431_v56  ;;  %v4201_v0 = vcombine.high %v1424_v55, %v1431_v56 }
  0x15   : > { %v1458_v1 = vrot.slane %v1450_v57, %v4590_v24  ;;  %v1465_v2 = vrot.slane %v1451_v58, %v4590_v24  ;;  %v1611_v3 = vrot.slane %v1604_v59, %v4588_v23  ;;  %v1619_v4 = vrot.slane %v4199_v60, %v4588_v23 }
  0x16   : > { %v1636_v5 = vrot.slane %v1629_v61, %v4588_v23  ;;  %v1644_v6 = vrot.slane %v4200_v62, %v4588_v23  ;;  %v1661_v7 = vrot.slane %v1654_v63, %v4588_v23  ;;  %v1669_v8 = vrot.slane %v4201_v0, %v4588_v23 }
  0x17   : > { %v1620_v10 = vcombine.low %v1611_v3, %v1619_v4  ;;  %v1679_v11 = vcombine.low %v1458_v1, %v1465_v2  ;;  %v4202_v12 = vcombine.high %v1458_v1, %v1465_v2  ;;  %v1312_v18 = vshrl.u32 %v1273_v48, 16 }
  0x18   : > { %v1645_v15 = vcombine.low %v1636_v5, %v1644_v6  ;;  %v1670_v16 = vcombine.low %v1661_v7, %v1669_v8  ;;  %v1316_v19 = vpack.i.b16 %v1281_v13, %v1277_v9  ;;  %v1317_v26 = vshrl.u32 %v1277_v9, 16 }
  0x19   : > { %v4634_v20 = vrot.slane %v1620_v10, %v4590_v24  ;;  %v1686_v21 = vrot.slane %v1679_v11, %v4588_v23  ;;  %v1694_v22 = vrot.slane %v4202_v12, %v4588_v23  ;;  %v1313_v31 = vpack.i.b16 %v1312_v18, %v1311_v14 }
  0x1a   : > { %v4642_v27 = vrot.slane %v1645_v15, %v4590_v24  ;;  %v4645_v28 = vrot.slane %v1670_v16, %v4590_v24  ;;  %v1318_v32 = vshrl.u32 %v1281_v13, 16  ;;  %v1322_v35 = vpack.i.b16 %v1274_v25, %v1270_v17 }
  0x1b   : > { %v1695_v33 = vcombine.low %v1686_v21, %v1694_v22  ;;  %v1807_v34 = vshrl.u32 %v4634_v20, 16  ;;  %v1323_v36 = vshrl.u32 %v1270_v17, 16  ;;  %v1324_v40 = vshrl.u32 %v1274_v25, 16 }
  0x1c   : > { %v1808_v37 = vshrl.u32 %v4642_v27, 16  ;;  %v1819_v38 = vshrl.u32 %v4645_v28, 16  ;;  %v1319_v39 = vpack.i.b16 %v1318_v32, %v1317_v26  ;;  %v1328_v42 = vpack.i.b16 %v1282_v30, %v1278_v29 }
  0x1d   : > { %v4657_v41 = vrot.slane %v1695_v33, %v4590_v24  ;;  %v1329_v43 = vshrl.u32 %v1278_v29, 16  ;;  %v1330_v44 = vshrl.u32 %v1282_v30, 16  ;;  %v1325_v46 = vpack.i.b16 %v1324_v40, %v1323_v36 }
  0x1e   : > { %v1809_v45 = vpack.i.b16 %v1808_v37, %v1807_v34  ;;  %v1475_v47 = vrot.slane %v1310_v52, %v4588_v23  ;;  %v1483_v48 = vrot.slane %v1316_v19, %v4588_v23  ;;  %v1509_v51 = vrot.slane %v1313_v31, %v4588_v23 }
  0x1f   : > { %v1820_v49 = vshrl.u32 %v4657_v41, 16  ;;  %v1331_v50 = vpack.i.b16 %v1330_v44, %v1329_v43  ;;  %v1517_v53 = vrot.slane %v1319_v39, %v4588_v23  ;;  %v1543_v56 = vrot.slane %v1322_v35, %v4588_v23 }
  0x20   : > { %v1484_v54 = vcombine.low %v1475_v47, %v1483_v48  ;;  %v1485_v55 = vcombine.high %v1475_v47, %v1483_v48  ;;  %v1551_v57 = vrot.slane %v1328_v42, %v4588_v23  ;;  %v1577_v52 = vrot.slane %v1325_v46, %v4588_v23 }
  0x21   : > { %v1821_v58 = vpack.i.b16 %v1820_v49, %v1819_v38  ;;  %v1518_v59 = vcombine.low %v1509_v51, %v1517_v53  ;;  %v1519_v60 = vcombine.high %v1509_v51, %v1517_v53  ;;  %v1585_v4 = vrot.slane %v1331_v50, %v4588_v23 }
  0x22   : > { %v1492_v61 = vrot.slane %v1484_v54, %v4590_v24  ;;  %v1499_v62 = vrot.slane %v1485_v55, %v4590_v24  ;;  %v1552_v63 = vcombine.low %v1543_v56, %v1551_v57  ;;  %v1553_v0 = vcombine.high %v1543_v56, %v1551_v57 }
  0x23   : > { %v4209_v1 = vcombine.low %v1809_v45, %v1821_v58  ;;  %v1526_v2 = vrot.slane %v1518_v59, %v4590_v24  ;;  %v1533_v3 = vrot.slane %v1519_v60, %v4590_v24  ;;  %v1586_v9 = vcombine.low %v1577_v52, %v1585_v4 }
  0x24   : > { %v1560_v5 = vrot.slane %v1552_v63, %v4590_v24  ;;  %v1567_v6 = vrot.slane %v1553_v0, %v4590_v24  ;;  %v1704_v7 = vcombine.low %v1492_v61, %v1499_v62  ;;  %v4203_v8 = vcombine.high %v1492_v61, %v1499_v62 }
  0x25   : > { %1864 = vrot.lane.b32.xlu0 %v4209_v1, %s5369_s29  ;;  %v1587_v10 = vcombine.high %v1577_v52, %v1585_v4  ;;  %v1729_v11 = vcombine.low %v1526_v2, %v1533_v3  ;;  %v4204_v12 = vcombine.high %v1526_v2, %v1533_v3  ;;  %v1594_v17 = vrot.slane %v1586_v9, %v4590_v24 }
  0x26   : > { %v1711_v13 = vrot.slane %v1704_v7, %v4588_v23  ;;  %v1719_v14 = vrot.slane %v4203_v8, %v4588_v23  ;;  %v1754_v15 = vcombine.low %v1560_v5, %v1567_v6  ;;  %v4205_v16 = vcombine.high %v1560_v5, %v1567_v6 }
  0x27   : > { %v1601_v18 = vrot.slane %v1587_v10, %v4590_v24  ;;  %v1736_v19 = vrot.slane %v1729_v11, %v4588_v23  ;;  %v1744_v21 = vrot.slane %v4204_v12, %v4588_v23  ;;  %v4471_v29 = vmov 0   ;;  %v462_v10 = vld [vmem:[%s5352_s2] sm:$0xf] }
  0x28   : > { %v1720_v22 = vcombine.low %v1711_v13, %v1719_v14  ;;  %v1761_v25 = vrot.slane %v1754_v15, %v4588_v23  ;;  %v1769_v26 = vrot.slane %v4205_v16, %v4588_v23  ;;  %v1628_v30 = vcombine.high %v4634_v20, %v4471_v29  ;;  %v463_v14 = vld [vmem:[%s5352_s2 + $0x4] sm:$0xf]  ;;  %v467_v16 = vld [vmem:[%s5352_s2 + $0x14] sm:$0xf] }
  0x29   : > { %v1745_v31 = vcombine.low %v1736_v19, %v1744_v21  ;;  %v1779_v32 = vcombine.low %v1594_v17, %v1601_v18  ;;  %v4206_v33 = vcombine.high %v1594_v17, %v1601_v18  ;;  %v1653_v34 = vcombine.high %v4642_v27, %v4471_v29  ;;  %v474_v17 = vld [vmem:[%s5352_s2 + $0x30] sm:$0xf] }
  0x2a   : > { %v1727_v35 = vrot.slane %v1720_v22, %v4590_v24  ;;  %v1770_v36 = vcombine.low %v1761_v25, %v1769_v26  ;;  %v1678_v37 = vcombine.high %v4645_v28, %v4471_v29  ;;  %v1703_v38 = vcombine.high %v4657_v41, %v4471_v29  ;;  %v471_v22 = vld [vmem:[%s5352_s2 + $0x24] sm:$0xf]  ;;  %v475_v25 = vld [vmem:[%s5352_s2 + $0x34] sm:$0xf] }
  0x2b   : > { %v1752_v39 = vrot.slane %v1745_v31, %v4590_v24  ;;  %v1786_v40 = vrot.slane %v1779_v32, %v4588_v23  ;;  %v1794_v42 = vrot.slane %v4206_v33, %v4588_v23  ;;  %v1812_v43 = vpack.i.b16 %v1653_v34, %v1628_v30 }
  0x2c   : > { %v1777_v44 = vrot.slane %v1770_v36, %v4590_v24  ;;  %v1831_v45 = vshrl.u32 %v1727_v35, 16  ;;  %v1824_v46 = vpack.i.b16 %v1703_v38, %v1678_v37  ;;  %v1813_v47 = vshrl.u32 %v1628_v30, 16 }
  0x2d   : > { %v1795_v48 = vcombine.low %v1786_v40, %v1794_v42  ;;  %v1832_v49 = vshrl.u32 %v1752_v39, 16  ;;  %v1814_v50 = vshrl.u32 %v1653_v34, 16  ;;  %v1825_v53 = vshrl.u32 %v1678_v37, 16 }
  0x2e   : > { %v4211_v51 = vcombine.low %v1812_v43, %v1824_v46  ;;  %v1826_v54 = vshrl.u32 %v1703_v38, 16  ;;  %v1728_v55 = vcombine.high %v1727_v35, %v4471_v29  ;;  %v1843_v57 = vshrl.u32 %v1777_v44, 16 }
  0x2f   : > { %v1802_v56 = vrot.slane %v1795_v48, %v4590_v24  ;;  %v1753_v58 = vcombine.high %v1752_v39, %v4471_v29  ;;  %v1833_v59 = vpack.i.b16 %v1832_v49, %v1831_v45  ;;  %v1815_v60 = vpack.i.b16 %v1814_v50, %v1813_v47 }
  0x30   : > { %1874 = vrot.lane.b32.xlu0 %v4211_v51, %s5365_s30  ;;  %v1778_v52 = vcombine.high %v1777_v44, %v4471_v29  ;;  %v1837_v61 = vshrl.u32 %v1728_v55, 16  ;;  %v1827_v2 = vpack.i.b16 %v1826_v54, %v1825_v53  ;;  %v1818_v4 = vpack.i.b16 %v4657_v41, %v4645_v28 }
  0x31   : > { %v1844_v62 = vshrl.u32 %v1802_v56, 16  ;;  %v1803_v63 = vcombine.high %v1802_v56, %v4471_v29  ;;  %v1836_v0 = vpack.i.b16 %v1753_v58, %v1728_v55  ;;  %v1838_v1 = vshrl.u32 %v1753_v58, 16 }
  0x32   : > { %v1849_v3 = vshrl.u32 %v1778_v52, 16  ;;  %v1806_v5 = vpack.i.b16 %v4642_v27, %v4634_v20  ;;  %v1842_v12 = vpack.i.b16 %v1802_v56, %v1777_v44  ;;  %v1830_v13 = vpack.i.b16 %v1752_v39, %v1727_v35  ;;  %v466_v20 = vld [vmem:[%s5352_s2 + $0x10] sm:$0xf]  ;;  %v470_v27 = vld [vmem:[%s5352_s2 + $0x20] sm:$0xf] }
  0x33   : > { %v1845_v6 = vpack.i.b16 %v1844_v62, %v1843_v57  ;;  %v1848_v7 = vpack.i.b16 %v1803_v63, %v1778_v52  ;;  %v1839_v8 = vpack.i.b16 %v1838_v1, %v1837_v61  ;;  %v1850_v9 = vshrl.u32 %v1803_v63, 16 }
  0x34   : > { %v4709_v11 = vcombine.low %v1806_v5, %v1818_v4  ;;  %v4213_v18 = vcombine.low %v1815_v60, %v1827_v2  ;;  %v4726_v19 = vcombine.low %v1830_v13, %v1842_v12  ;;  %v4473_v21 = vmov 0.0  }
  0x35   : > { %v4210_v28 = vcombine.low %v1833_v59, %v1845_v6  ;;  %v4212_v41 = vcombine.low %v1836_v0, %v1848_v7  ;;  %v1851_v15 = vpack.i.b16 %v1850_v9, %v1849_v3  ;;  %4299 = vmatprep.subr.bf16.mxu1 %v4473_v21  ;;  %v481_v26 = vpack.i.b16 %v466_v20, %v462_v10 }
  0x36   : > { %v482_v30 = vshrl.u32 %v462_v10, 16  ;;  %4291 = vmatprep.subr.bf16.mxu0 %v4473_v21  ;;  %v483_v32 = vshrl.u32 %v466_v20, 16  ;;  %v487_v33 = vpack.i.b16 %v474_v17, %v470_v27  ;;  %v488_v34 = vshrl.u32 %v470_v27, 16 }
  0x37   : > { %1866 = vrot.lane.b32.xlu1 %v4210_v28, %s5369_s29  ;;  %1876 = vrot.lane.b32.xlu0 %v4212_v41, %s5365_s30  ;;  %v4214_v31 = vcombine.low %v1839_v8, %v1851_v15  ;;  %v489_v35 = vshrl.u32 %v474_v17, 16  ;;  %v493_v36 = vpack.i.b16 %v467_v16, %v463_v14  ;;  %v494_v37 = vshrl.u32 %v463_v14, 16 }
  0x38   : > { %v495_v38 = vshrl.u32 %v467_v16, 16  ;;  %v484_v39 = vpack.i.b16 %v483_v32, %v482_v30  ;;  %v499_v40 = vpack.i.b16 %v475_v25, %v471_v22  ;;  %v500_v42 = vshrl.u32 %v471_v22, 16  ;;  %v464_v16 = vld [vmem:[%s5352_s2 + $0x8] sm:$0xf] }
  0x39   : > { %v501_v43 = vshrl.u32 %v475_v25, 16  ;;  %v490_v44 = vpack.i.b16 %v489_v35, %v488_v34  ;;  %v534_v46 = vrot.slane %v481_v26, %v4588_v23  ;;  %v542_v47 = vrot.slane %v487_v33, %v4588_v23  ;;  %v468_v25 = vld [vmem:[%s5352_s2 + $0x18] sm:$0xf]  ;;  %v472_v32 = vld [vmem:[%s5352_s2 + $0x28] sm:$0xf] }
  0x3a   : > { %v496_v45 = vpack.i.b16 %v495_v38, %v494_v37  ;;  %v568_v49 = vrot.slane %v484_v39, %v4588_v23  ;;  %v602_v50 = vrot.slane %v493_v36, %v4588_v23  ;;  %v610_v51 = vrot.slane %v499_v40, %v4588_v23  ;;  %v476_v35 = vld [vmem:[%s5352_s2 + $0x38] sm:$0xf] }
  0x3b   : > { %1884 = vrot.lane.b32.xlu1 %v4213_v18, %s5363_s17  ;;  %v502_v48 = vpack.i.b16 %v501_v43, %v500_v42  ;;  %v543_v53 = vcombine.low %v534_v46, %v542_v47  ;;  %v544_v54 = vcombine.high %v534_v46, %v542_v47  ;;  %v576_v55 = vrot.slane %v490_v44, %v4588_v23 }
  0x3c   : > { %v636_v56 = vrot.slane %v496_v45, %v4588_v23  ;;  %v611_v57 = vcombine.low %v602_v50, %v610_v51  ;;  %v612_v58 = vcombine.high %v602_v50, %v610_v51  ;;  %vm4475_vm0 = vmmov 0   ;;  %v465_v50 = vld [vmem:[%s5352_s2 + $0xc] sm:$0xf] }
  0x3d   : > { %v644_v59 = vrot.slane %v502_v48, %v4588_v23  ;;  %v551_v60 = vrot.slane %v543_v53, %v4590_v24  ;;  %v558_v52 = vrot.slane %v544_v54, %v4590_v24  ;;  %v577_v61 = vcombine.low %v568_v49, %v576_v55  ;;  %4303 = vmatprep.mubr.msk.bf16.mxu1 %vm4475_vm0, %v4473_v21 }
  0x3e   : > { %v578_v62 = vcombine.high %v568_v49, %v576_v55  ;;  %v619_v63 = vrot.slane %v611_v57, %v4590_v24  ;;  %v626_v0 = vrot.slane %v612_v58, %v4590_v24  ;;  %4295 = vmatprep.mubr.msk.bf16.mxu0 %vm4475_vm0, %v4473_v21  ;;  %v505_v36 = vpack.i.b16 %v468_v25, %v464_v16 }
  0x3f   : > { %1886 = vrot.lane.b32.xlu1 %v4214_v31, %s5363_s17  ;;  %v645_v1 = vcombine.low %v636_v56, %v644_v59  ;;  %v646_v2 = vcombine.high %v636_v56, %v644_v59  ;;  %v585_v3 = vrot.slane %v577_v61, %v4590_v24  ;;  %v799_v5 = vcombine.low %v551_v60, %v558_v52  ;;  %v469_v56 = vld [vmem:[%s5352_s2 + $0x1c] sm:$0xf] }
  0x40   : > { %v592_v4 = vrot.slane %v578_v62, %v4590_v24  ;;  %v4182_v6 = vcombine.high %v551_v60, %v558_v52  ;;  %v849_v9 = vcombine.low %v619_v63, %v626_v0  ;;  %v4184_v10 = vcombine.high %v619_v63, %v626_v0  ;;  %v473_v52 = vld [vmem:[%s5352_s2 + $0x2c] sm:$0xf] }
  0x41   : > { %v653_v7 = vrot.slane %v645_v1, %v4590_v24  ;;  %v660_v8 = vrot.slane %v646_v2, %v4590_v24  ;;  %v806_v12 = vrot.slane %v799_v5, %v4588_v23  ;;  %v506_v37 = vshrl.u32 %v464_v16, 16  ;;  %v477_v1 = vld [vmem:[%s5352_s2 + $0x3c] sm:$0xf] }
  0x42   : > { %v814_v13 = vrot.slane %v4182_v6, %v4588_v23  ;;  %v824_v14 = vcombine.low %v585_v3, %v592_v4  ;;  %v4183_v20 = vcombine.high %v585_v3, %v592_v4  ;;  %v856_v27 = vrot.slane %v849_v9, %v4588_v23 }
  0x43   : > { %v864_v28 = vrot.slane %v4184_v10, %v4588_v23  ;;  %v874_v41 = vcombine.low %v653_v7, %v660_v8  ;;  %v4185_v15 = vcombine.high %v653_v7, %v660_v8  ;;  %v507_v40 = vshrl.u32 %v468_v25, 16 }
  0x44   : > { %v815_v17 = vcombine.low %v806_v12, %v814_v13  ;;  %v831_v18 = vrot.slane %v824_v14, %v4588_v23  ;;  %v839_v22 = vrot.slane %v4183_v20, %v4588_v23  ;;  %v511_v42 = vpack.i.b16 %v476_v35, %v472_v32 }
  0x45   : > { %v865_v26 = vcombine.low %v856_v27, %v864_v28  ;;  %v881_v30 = vrot.slane %v874_v41, %v4588_v23  ;;  %v889_v31 = vrot.slane %v4185_v15, %v4588_v23  ;;  %v512_v46 = vshrl.u32 %v472_v32, 16 }
  0x46   : > { %v4778_v33 = vrot.slane %v815_v17, %v4590_v24  ;;  %v840_v34 = vcombine.low %v831_v18, %v839_v22  ;;  %v508_v51 = vpack.i.b16 %v507_v40, %v506_v37  ;;  %v513_v57 = vshrl.u32 %v476_v35, 16 }
  0x47   : > { %v4784_v38 = vrot.slane %v865_v26, %v4590_v24  ;;  %v890_v39 = vcombine.low %v881_v30, %v889_v31  ;;  %v517_v61 = vpack.i.b16 %v469_v56, %v465_v50  ;;  %v518_v6 = vshrl.u32 %v465_v50, 16 }
  0x48   : > { %v4787_v43 = vrot.slane %v840_v34, %v4590_v24  ;;  %v1002_v44 = vshrl.u32 %v4778_v33, 16  ;;  %v823_v45 = vcombine.high %v4778_v33, %v4471_v29  ;;  %v514_v2 = vpack.i.b16 %v513_v57, %v512_v46 }
  0x49   : > { %v4793_v47 = vrot.slane %v890_v39, %v4590_v24  ;;  %v1014_v48 = vshrl.u32 %v4784_v38, 16  ;;  %v873_v49 = vcombine.high %v4784_v38, %v4471_v29  ;;  %v519_v8 = vshrl.u32 %v469_v56, 16 }
  0x4a   : > { %v1003_v53 = vshrl.u32 %v4787_v43, 16  ;;  %v848_v54 = vcombine.high %v4787_v43, %v4471_v29  ;;  %v1008_v55 = vshrl.u32 %v823_v45, 16  ;;  %v523_v9 = vpack.i.b16 %v477_v1, %v473_v52 }
  0x4b   : > { %v1015_v58 = vshrl.u32 %v4793_v47, 16  ;;  %v898_v59 = vcombine.high %v4793_v47, %v4471_v29  ;;  %v1020_v60 = vshrl.u32 %v873_v49, 16  ;;  %v524_v10 = vshrl.u32 %v473_v52, 16 }
  0x4c   : > { %v1004_v62 = vpack.i.b16 %v1003_v53, %v1002_v44  ;;  %v1007_v63 = vpack.i.b16 %v848_v54, %v823_v45  ;;  %v1009_v0 = vshrl.u32 %v848_v54, 16  ;;  %v525_v20 = vshrl.u32 %v477_v1, 16  ;;  %v4422_v53 = vld [vmem:[%s5355_s5] ss:$0 sps:$4 sm:$0xff]  }
  0x4d   : > { %v1016_v3 = vpack.i.b16 %v1015_v58, %v1014_v48  ;;  %v1019_v4 = vpack.i.b16 %v898_v59, %v873_v49  ;;  %v1021_v5 = vshrl.u32 %v898_v59, 16  ;;  %v520_v27 = vpack.i.b16 %v519_v8, %v518_v6 }
  0x4e   : > { %v1010_v7 = vpack.i.b16 %v1009_v0, %v1008_v55  ;;  %v670_v28 = vrot.slane %v505_v36, %v4588_v23  ;;  %v678_v41 = vrot.slane %v511_v42, %v4588_v23  ;;  %v704_v15 = vrot.slane %v508_v51, %v4588_v23 }
  0x4f   : > { %v4192_v12 = vcombine.low %v1004_v62, %v1016_v3  ;;  %v4194_v13 = vcombine.low %v1007_v63, %v1019_v4  ;;  %v1022_v14 = vpack.i.b16 %v1021_v5, %v1020_v60  ;;  %v526_v17 = vpack.i.b16 %v525_v20, %v524_v10 }
  0x50   : > { %v712_v18 = vrot.slane %v514_v2, %v4588_v23  ;;  %v679_v22 = vcombine.low %v670_v28, %v678_v41  ;;  %v680_v25 = vcombine.high %v670_v28, %v678_v41  ;;  %v738_v26 = vrot.slane %v517_v61, %v4588_v23 }
  0x51   : > { %1059 = vrot.lane.b32.xlu0 %v4192_v12, %s5369_s29  ;;  %1069 = vrot.lane.b32.xlu1 %v4194_v13, %s5365_s30  ;;  %v4196_v16 = vcombine.low %v1010_v7, %v1022_v14  ;;  %v746_v30 = vrot.slane %v523_v9, %v4588_v23  ;;  %v772_v34 = vrot.slane %v520_v27, %v4588_v23  ;;  %vm1083_vm1 = vcmask 64512  }
  0x52   : > { %v713_v31 = vcombine.low %v704_v15, %v712_v18  ;;  %v714_v32 = vcombine.high %v704_v15, %v712_v18  ;;  %v780_v35 = vrot.slane %v526_v17, %v4588_v23  ;;  %v687_v36 = vrot.slane %v679_v22, %v4590_v24 }
  0x53   : > { %v694_v37 = vrot.slane %v680_v25, %v4590_v24  ;;  %v747_v39 = vcombine.low %v738_v26, %v746_v30  ;;  %v748_v40 = vcombine.high %v738_v26, %v746_v30  ;;  %v1911_v4 = vrot.slane %v4422_v53, %v4588_v23 }
  0x54   : > { %v721_v42 = vrot.slane %v713_v31, %v4590_v24  ;;  %v728_v44 = vrot.slane %v714_v32, %v4590_v24  ;;  %v781_v45 = vcombine.low %v772_v34, %v780_v35  ;;  %v782_v46 = vcombine.high %v772_v34, %v780_v35 }
  0x55   : > { %1079 = vrot.lane.b32.xlu0 %v4196_v16, %s5363_s17  ;;  %v755_v48 = vrot.slane %v747_v39, %v4590_v24  ;;  %v762_v49 = vrot.slane %v748_v40, %v4590_v24  ;;  %v899_v50 = vcombine.low %v687_v36, %v694_v37  ;;  %v4186_v51 = vcombine.high %v687_v36, %v694_v37 }
  0x56   : > { %v789_v54 = vrot.slane %v781_v45, %v4590_v24  ;;  %v796_v55 = vrot.slane %v782_v46, %v4590_v24  ;;  %v924_v56 = vcombine.low %v721_v42, %v728_v44  ;;  %v4187_v57 = vcombine.high %v721_v42, %v728_v44 }
  0x57   : > { %v906_v58 = vrot.slane %v899_v50, %v4588_v23  ;;  %v914_v59 = vrot.slane %v4186_v51, %v4588_v23  ;;  %v949_v60 = vcombine.low %v755_v48, %v762_v49  ;;  %v4188_v52 = vcombine.high %v755_v48, %v762_v49 }
  0x58   : > { %v931_v61 = vrot.slane %v924_v56, %v4588_v23  ;;  %v939_v62 = vrot.slane %v4187_v57, %v4588_v23  ;;  %v974_v63 = vcombine.low %v789_v54, %v796_v55  ;;  %v4189_v0 = vcombine.high %v789_v54, %v796_v55 }
  0x59   : > { %v915_v1 = vcombine.low %v906_v58, %v914_v59  ;;  %v956_v2 = vrot.slane %v949_v60, %v4588_v23  ;;  %v964_v3 = vrot.slane %v4188_v52, %v4588_v23  ;;  %v1013_v8 = vpack.i.b16 %v4793_v47, %v4784_v38 }
  0x5a   : > { %v940_v5 = vcombine.low %v931_v61, %v939_v62  ;;  %v981_v6 = vrot.slane %v974_v63, %v4588_v23  ;;  %v989_v7 = vrot.slane %v4189_v0, %v4588_v23  ;;  %v1001_v14 = vpack.i.b16 %v4787_v43, %v4778_v33  ;;  %v460_v0 = vld [vmem:[%s449_s16] sm:$0xff]  ;;  %s5374_s16 = smov 16  }
  0x5b   : > { %v922_v9 = vrot.slane %v915_v1, %v4590_v24  ;;  %v965_v10 = vcombine.low %v956_v2, %v964_v3  ;;  %v1912_v41 = vcombine.low %v1911_v4, %v1911_v4  ;;  %v1913_v32 = vcombine.high %v1911_v4, %v1911_v4 }
  0x5c   : > { %v947_v12 = vrot.slane %v940_v5, %v4590_v24  ;;  %v990_v13 = vcombine.low %v981_v6, %v989_v7  ;;  %v4190_v37 = vcombine.low %v1001_v14, %v1013_v8  ;;  %vm1090_vm2 = vcmask 130048  }
  0x5d   : > { %v972_v20 = vrot.slane %v965_v10, %v4590_v24  ;;  %v1026_v27 = vshrl.u32 %v922_v9, 16  ;;  %v923_v28 = vcombine.high %v922_v9, %v4471_v29  ;;  %v4860_v31 = vrot.slane %v1912_v41, %v4590_v24  ;;  %v2069_v41 = vld [vmem:[%s5356_s6 + $0x4] sm:$0xf] }
  0x5e   : > { %v997_v15 = vrot.slane %v990_v13, %v4590_v24  ;;  %v1027_v16 = vshrl.u32 %v947_v12, 16  ;;  %v948_v38 = vcombine.high %v947_v12, %v4471_v29  ;;  %v1025_v40 = vpack.i.b16 %v947_v12, %v922_v9  ;;  %v458_v13 = vld [vmem:[%s4903_s19] sm:$0xff] }
  0x5f   : > { %v1038_v47 = vshrl.u32 %v972_v20, 16  ;;  %v973_v17 = vcombine.high %v972_v20, %v4471_v29  ;;  %v1032_v18 = vshrl.u32 %v923_v28, 16  ;;  %v1929_v50 = vcombine.high %v4860_v31, %v4860_v31 }
  0x60   : > { %v1028_v22 = vpack.i.b16 %v1027_v16, %v1026_v27  ;;  %v1039_v25 = vshrl.u32 %v997_v15, 16  ;;  %v998_v26 = vcombine.high %v997_v15, %v4471_v29  ;;  %v1031_v33 = vpack.i.b16 %v948_v38, %v923_v28  ;;  %v2068_v28 = vld [vmem:[%s5356_s6] sm:$0xf]  ;;  %v2073_v16 = vld [vmem:[%s5356_s6 + $0x14] sm:$0xf] }
  0x61   : > { %v1033_v43 = vshrl.u32 %v948_v38, 16  ;;  %v1044_v30 = vshrl.u32 %v973_v17, 16  ;;  %v1037_v42 = vpack.i.b16 %v997_v15, %v972_v20  ;;  %v1927_v51 = vrot.slane %v1913_v32, %v4590_v24  ;;  %v2072_v15 = vld [vmem:[%s5356_s6 + $0x10] sm:$0xf]  ;;  %v2076_v38 = vld [vmem:[%s5356_s6 + $0x20] sm:$0xf] }
  0x62   : > { %v1040_v34 = vpack.i.b16 %v1039_v25, %v1038_v47  ;;  %v1043_v35 = vpack.i.b16 %v998_v26, %v973_v17  ;;  %v1045_v36 = vshrl.u32 %v998_v26, 16  ;;  %vm1095_vm3 = vcmask 195584   ;;  %v2077_v47 = vld [vmem:[%s5356_s6 + $0x24] sm:$0xf]  ;;  %v2080_v17 = vld [vmem:[%s5356_s6 + $0x30] sm:$0xf] }
  0x63   : > { %v1034_v39 = vpack.i.b16 %v1033_v43, %v1032_v18  ;;  %v4191_v48 = vcombine.low %v1025_v40, %v1037_v42  ;;  %v1930_v53 = vcombine.low %v1927_v51, %v1927_v51  ;;  %v1931_v54 = vcombine.high %v1927_v51, %v1927_v51  ;;  %v2081_v18 = vld [vmem:[%s5356_s6 + $0x34] sm:$0xf] }
  0x64   : > { %v4193_v44 = vcombine.low %v1028_v22, %v1040_v34  ;;  %v4195_v45 = vcombine.low %v1031_v33, %v1043_v35  ;;  %v1046_v46 = vpack.i.b16 %v1045_v36, %v1044_v30  ;;  %v4888_v2 = vpack.c.bf16 %v460_v0, %v460_v0 }
  0x65   : > { %vm1145_vm4 = vcmask 261120   ;;  %v459_v27 = vpack.c.bf16 %v458_v13, %v458_v13  ;;  %v2088_v22 = vshrl.u32 %v2068_v28, 16  ;;  %v2089_v25 = vshrl.u32 %v2072_v15, 16 }
  0x66   : > { %1061 = vrot.lane.b32.xlu1 %v4193_v44, %s5369_s29  ;;  %1071 = vrot.lane.b32.xlu0 %v4195_v45, %s5365_s30  ;;  %v4197_v49 = vcombine.low %v1034_v39, %v1046_v46  ;;  %v2087_v26 = vpack.i.b16 %v2072_v15, %v2068_v28  ;;  %v2093_v33 = vpack.i.b16 %v2080_v17, %v2076_v38  ;;  %v2094_v43 = vshrl.u32 %v2076_v38, 16 }
  0x67   : > { %v2095_v30 = vshrl.u32 %v2080_v17, 16  ;;  %v2090_v32 = vpack.i.b16 %v2089_v25, %v2088_v22  ;;  %v2099_v34 = vpack.i.b16 %v2073_v16, %v2069_v41  ;;  %v2100_v35 = vshrl.u32 %v2069_v41, 16 }
  0x68   : > { %v2101_v36 = vshrl.u32 %v2073_v16, 16  ;;  %v2105_v39 = vpack.i.b16 %v2081_v18, %v2077_v47  ;;  %v2106_v40 = vshrl.u32 %v2077_v47, 16  ;;  %v2107_v42 = vshrl.u32 %v2081_v18, 16 }
  0x69   : > { %v2140_v45 = vrot.slane %v2087_v26, %v4588_v23  ;;  %v2148_v46 = vrot.slane %v2093_v33, %v4588_v23  ;;  %v2208_v51 = vrot.slane %v2099_v34, %v4588_v23  ;;  %vm3365_vm5 = vcmask 1043456  }
  0x6a   : > { %1081 = vrot.lane.b32.xlu1 %v4197_v49, %s5363_s17  ;;  %1933 = vrot.lane.b32.xlu0 %v1929_v50, %s5369_s29  ;;  %v2102_v44 = vpack.i.b16 %v2101_v36, %v2100_v35  ;;  %v2108_v49 = vpack.i.b16 %v2107_v42, %v2106_v40 }
  0x6e   : > { %1937 = vrot.lane.b32.xlu1 %v1930_v53, %s5365_s30  ;;  %1941 = vrot.lane.b32.xlu0 %v1931_v54, %s5363_s17  ;;  %v2216_v53 = vrot.slane %v2105_v39, %v4588_v23  ;;  %v2149_v54 = vcombine.low %v2140_v45, %v2148_v46 }
  0x97   : > { %v1865_v55 = vpop.permute.xlu0 %1864 }
  0x98   : > { %v1890_v58 = vsel %vm1083_vm1, %v4709_v11, %v1865_v55  ;;  %v2150_v55 = vcombine.high %v2140_v45, %v2148_v46 }
  0xa2   : > { %v1875_v56 = vpop.permute.xlu0 %1874 }
  0xa3   : > { %v1895_v59 = vsel %vm1090_vm2, %v1890_v58, %v1875_v56  ;;  %v2242_v56 = vrot.slane %v2102_v44, %v4588_v23 }
  0xa9   : > { %v1867_v57 = vpop.permute.xlu1 %1866  ;;  %v1877_v60 = vpop.permute.xlu0 %1876 }
  0xaa   : > { %v1893_v61 = vsel %vm1083_vm1, %v4726_v19, %v1867_v57 }
  0xab   : > { %v1897_v63 = vsel %vm1090_vm2, %v1893_v61, %v1877_v60  ;;  %v2218_v60 = vcombine.high %v2208_v51, %v2216_v53  ;;  %v2164_v61 = vrot.slane %v2150_v55, %v4590_v24 }
  0xad   : > { %v1885_v52 = vpop.permute.xlu1 %1884 }
  0xae   : > { %v1899_v62 = vsel %vm1095_vm3, %v1895_v59, %v1885_v52  ;;  %v2217_v59 = vcombine.low %v2208_v51, %v2216_v53  ;;  %v2157_v52 = vrot.slane %v2149_v54, %v4590_v24 }
  0xaf   : > { %4300 = vmatpush3.bf16.msra.mxu1 %v1899_v62  ;;  %v2250_v62 = vrot.slane %v2108_v49, %v4588_v23 }
  0xb0   : > { %4301 = vmatprep.subr.bf16.mxu1 %v4473_v21 }
  0xb1   : > { %v1887_v11 = vpop.permute.xlu1 %1886 }
  0xb2   : > { %v1902_v1 = vsel %vm1095_vm3, %v1897_v63, %v1887_v11  ;;  %v2225_v11 = vrot.slane %v2217_v59, %v4590_v24 }
  0xb3   : > { %4302 = vmatpush3.bf16.msra.mxu1 %v1902_v1  ;;  %v2232_v1 = vrot.slane %v2218_v60, %v4590_v24 }
  0xb4   : > { %4315 = vmatprep.subr.bf16.mxu1 %v4473_v21 }
  0xb5   : > { %v4218_v13 = vcombine.high %v2225_v11, %v2232_v1 }
  0xb6   : > { %4304 = vmatmul.mubr.msk.bf16.vlgmr.msra.gmra.mrb[0].mxu1 %vm1145_vm4, %v4888_v2 }
  0xb7   : > { %4317 = vmatprep.mubr.msk.bf16.mxu1 %vm4475_vm0, %v4473_v21  ;;  %v2470_v18 = vrot.slane %v4218_v13, %v4588_v23 }
  0xc3   : > { %v1060_v19 = vpop.permute.xlu0 %1059  ;;  %v1070_v4 = vpop.permute.xlu1 %1069 }
  0xc4   : > { %v1086_v3 = vsel %vm1083_vm1, %v4190_v37, %v1060_v19  ;;  %v2096_v37 = vpack.i.b16 %v2095_v30, %v2094_v43  ;;  %v4423_v19 = vld [vmem:[%s5353_s3] ss:$0 sps:$4 sm:$0xff]  }
  0xc5   : > { %v1092_v5 = vsel %vm1090_vm2, %v1086_v3, %v1070_v4  ;;  %v2251_v3 = vcombine.low %v2242_v56, %v2250_v62  ;;  %v2252_v4 = vcombine.high %v2242_v56, %v2250_v62 }
  0xc6   : > { %v2182_v50 = vrot.slane %v2096_v37, %v4588_v23 }
  0xc7   : > { %v1080_v6 = vpop.permute.xlu0 %1079 }
  0xc8   : > { %v1097_v7 = vsel %vm1095_vm3, %v1092_v5, %v1080_v6  ;;  %v2405_v5 = vcombine.low %v2157_v52, %v2164_v61  ;;  %v4216_v6 = vcombine.high %v2157_v52, %v2164_v61 }
  0xc9   : > { %4292 = vmatpush3.bf16.msra.mxu0 %v1097_v7 }
  0xca   : > { %4293 = vmatprep.subr.bf16.mxu0 %v4473_v21  ;;  %v2412_v41 = vrot.slane %v2405_v5, %v4588_v23  ;;  %v2420_v15 = vrot.slane %v4216_v6, %v4588_v23 }
  0xcc   : > { %v2421_v43 = vcombine.low %v2412_v41, %v2420_v15 }
  0xce   : > { %v2428_v40 = vrot.slane %v2421_v43, %v4590_v24 }
  0xd0   : > { %v2608_v56 = vshrl.u32 %v2428_v40, 16 }
  0xd8   : > { %v1062_v8 = vpop.permute.xlu1 %1061  ;;  %v1072_v9 = vpop.permute.xlu0 %1071 }
  0xd9   : > { %v1089_v10 = vsel %vm1083_vm1, %v4191_v48, %v1062_v8  ;;  %v2174_v48 = vrot.slane %v2090_v32, %v4588_v23 }
  0xda   : > { %v1094_v12 = vsel %vm1090_vm2, %v1089_v10, %v1072_v9  ;;  %v2259_v9 = vrot.slane %v2251_v3, %v4590_v24  ;;  %v2266_v10 = vrot.slane %v2252_v4, %v4590_v24  ;;  %v2429_v3 = vcombine.high %v2428_v40, %v4471_v29 }
  0xdb   : > { %v2183_v57 = vcombine.low %v2174_v48, %v2182_v50  ;;  %v2184_v58 = vcombine.high %v2174_v48, %v2182_v50 }
  0xdc   : > { %v1082_v14 = vpop.permute.xlu1 %1081  ;;  %v4219_v28 = vcombine.high %v2259_v9, %v2266_v10  ;;  %v1934_v47 = vpop.permute.xlu0 %1933 }
  0xdd   : > { %v1100_v20 = vsel %vm1095_vm3, %v1094_v12, %v1082_v14  ;;  %v2191_v63 = vrot.slane %v2183_v57, %v4590_v24  ;;  %v2198_v0 = vrot.slane %v2184_v58, %v4590_v24  ;;  %v2455_v12 = vcombine.low %v2225_v11, %v2232_v1 }
  0xde   : > { %4294 = vmatpush3.bf16.msra.mxu0 %v1100_v20  ;;  %v1928_v14 = vcombine.low %v4860_v31, %v4860_v31  ;;  %v1109_v20 = vrot.slane %v4423_v19, %v4588_v23  ;;  %v2495_v31 = vrot.slane %v4219_v28, %v4588_v23 }
  0xdf   : > { %4307 = vmatprep.subr.bf16.mxu0 %v4473_v21  ;;  %v2430_v7 = vcombine.low %v2191_v63, %v2198_v0  ;;  %v4217_v8 = vcombine.high %v2191_v63, %v2198_v0  ;;  %v2462_v17 = vrot.slane %v2455_v12, %v4588_v23 }
  0xe0   : > { %v1944_v25 = vsel %vm1083_vm1, %v1928_v14, %v1934_v47  ;;  %v1938_v26 = vpop.permute.xlu1 %1937  ;;  %v1110_v33 = vcombine.low %v1109_v20, %v1109_v20  ;;  %v1942_v36 = vpop.permute.xlu0 %1941  ;;  %v1111_v39 = vcombine.high %v1109_v20, %v1109_v20 }
  0xe1   : > { %4296 = vmatmul.mubr.msk.bf16.vlgmr.msra.gmra.mrb[0].mxu0 %vm1145_vm4, %v459_v27  ;;  %v2480_v27 = vcombine.low %v2259_v9, %v2266_v10  ;;  %v2437_v16 = vrot.slane %v2430_v7, %v4588_v23  ;;  %v2445_v38 = vrot.slane %v4217_v8, %v4588_v23  ;;  %v2471_v32 = vcombine.low %v2462_v17, %v2470_v18 }
  0xe2   : > { %4311 = vmatprep.mubr.msk.bf16.mxu0 %vm4475_vm0, %v4473_v21  ;;  %v1945_v35 = vsel %vm1090_vm2, %v1944_v25, %v1938_v26  ;;  %v1118_v37 = vrot.slane %v1110_v33, %v4590_v24  ;;  %v1125_v54 = vrot.slane %v1111_v39, %v4590_v24  ;;  %v2614_v9 = vshrl.u32 %v2429_v3, 16  ;;  %v2075_v39 = vld [vmem:[%s5356_s6 + $0x1c] sm:$0xf] }
  0xe3   : > { %v2487_v22 = vrot.slane %v2480_v27, %v4588_v23  ;;  %v2446_v30 = vcombine.low %v2437_v16, %v2445_v38  ;;  %v2478_v44 = vrot.slane %v2471_v32, %v4590_v24  ;;  %v1946_v46 = vsel %vm1095_vm3, %v1945_v35, %v1942_v36  ;;  %v2070_v32 = vld [vmem:[%s5356_s6 + $0x8] sm:$0xf]  ;;  %v2074_v35 = vld [vmem:[%s5356_s6 + $0x18] sm:$0xf] }
  0xe4   : > { %v1127_v53 = vcombine.high %v1118_v37, %v1118_v37  ;;  %v1128_v60 = vcombine.low %v1125_v54, %v1125_v54  ;;  %v1129_v52 = vcombine.high %v1125_v54, %v1125_v54  ;;  %v1126_v18 = vcombine.low %v1118_v37, %v1118_v37  ;;  %v2078_v36 = vld [vmem:[%s5356_s6 + $0x28] sm:$0xf]  ;;  %v2082_v37 = vld [vmem:[%s5356_s6 + $0x38] sm:$0xf] }
  0xe5   : > { %v2496_v34 = vcombine.low %v2487_v22, %v2495_v31  ;;  %v2453_v42 = vrot.slane %v2446_v30, %v4590_v24  ;;  %v2620_v58 = vshrl.u32 %v2478_v44, 16  ;;  %v2479_v5 = vcombine.high %v2478_v44, %v4471_v29 }
  0xe7   : > { %v2503_v45 = vrot.slane %v2496_v34, %v4590_v24  ;;  %v2609_v57 = vshrl.u32 %v2453_v42, 16  ;;  %v2454_v4 = vcombine.high %v2453_v42, %v4471_v29  ;;  %v2626_v12 = vshrl.u32 %v2479_v5, 16  ;;  %v2071_v34 = vld [vmem:[%s5356_s6 + $0xc] sm:$0xf] }
  0xe8   : > { %v2607_v28 = vpack.i.b16 %v2453_v42, %v2428_v40  ;;  %v2079_v40 = vld [vmem:[%s5356_s6 + $0x2c] sm:$0xf]  ;;  %v2083_v42 = vld [vmem:[%s5356_s6 + $0x3c] sm:$0xf] }
  0xe9   : > { %v2621_v59 = vshrl.u32 %v2503_v45, 16  ;;  %v2610_v61 = vpack.i.b16 %v2609_v57, %v2608_v56  ;;  %v2504_v6 = vcombine.high %v2503_v45, %v4471_v29  ;;  %v2613_v7 = vpack.i.b16 %v2454_v4, %v2429_v3 }
  0xea   : > { %v2615_v10 = vshrl.u32 %v2454_v4, 16  ;;  %v2619_v41 = vpack.i.b16 %v2503_v45, %v2478_v44  ;;  %v2112_v44 = vshrl.u32 %v2070_v32, 16  ;;  %v2113_v45 = vshrl.u32 %v2074_v35, 16 }
  0xeb   : > { %v2622_v62 = vpack.i.b16 %v2621_v59, %v2620_v58  ;;  %v2625_v8 = vpack.i.b16 %v2504_v6, %v2479_v5  ;;  %v2627_v13 = vshrl.u32 %v2504_v6, 16  ;;  %v2131_v54 = vshrl.u32 %v2083_v42, 16 }
  0xec   : > { %v4994_v20 = vpack.i.b16 %v2615_v10, %v2614_v9  ;;  %v5000_v16 = vcombine.low %v2607_v28, %v2619_v41  ;;  %v2111_v56 = vpack.i.b16 %v2074_v35, %v2070_v32  ;;  %v2117_v57 = vpack.i.b16 %v2082_v37, %v2078_v36 }
  0xed   : > { %v4226_v63 = vcombine.low %v2610_v61, %v2622_v62  ;;  %v4992_v14 = vcombine.low %v2613_v7, %v2625_v8  ;;  %v4996_v27 = vpack.i.b16 %v2627_v13, %v2626_v12  ;;  %v2114_v58 = vpack.i.b16 %v2113_v45, %v2112_v44 }
  0xef   : > { %v4230_v15 = vcombine.low %v4994_v20, %v4996_v27  ;;  %v2310_v3 = vrot.slane %v2114_v58, %v4588_v23 }
 0x189   : > { %v1984_v48 = vpop.f32.mrb[0].mxu1 }
 0x18a   : > { %v4975_v49 = vadd.f32 %v1984_v48, %v1946_v46  ;;  %v4305_v50 = vpop.f32.mrb[1].mxu1  ;;  %v2118_v46 = vshrl.u32 %v2078_v36, 16  ;;  %v2119_v48 = vshrl.u32 %v2082_v37, 16 }
 0x18b   : > { %v1987_v51 = vpop.f32.mrb[2].mxu1  ;;  %v2124_v50 = vshrl.u32 %v2071_v34, 16 }
 0x18c   : > { %1994 = vrot.lane.b32.xlu0 %v4975_v49, %s5367_s28  ;;  %1991 = vrot.lane.b32.xlu1 %v4975_v49, %s5368_s14  ;;  %v4306_v55 = vpop.f32.mrb[3].mxu1  ;;  %v2125_v51 = vshrl.u32 %v2075_v39, 16  ;;  %v2120_v59 = vpack.i.b16 %v2119_v48, %v2118_v46 }
 0x18e   : > { %v2126_v62 = vpack.i.b16 %v2125_v51, %v2124_v50  ;;  %v2318_v4 = vrot.slane %v2120_v59, %v4588_v23 }
 0x190   : > { %1997 = vrot.lane.b32.xlu1 %v4975_v49, %s5371_s15  ;;  %1131 = vrot.lane.b32.xlu0 %v1127_v53, %s5369_s29  ;;  %v2130_v53 = vshrl.u32 %v2079_v40, 16  ;;  %v2378_v9 = vrot.slane %v2126_v62, %v4588_v23 }
 0x194   : > { %1135 = vrot.lane.b32.xlu1 %v1128_v60, %s5374_s16  ;;  %1139 = vrot.lane.b32.xlu0 %v1129_v52, %s5375_s21  ;;  %v2123_v60 = vpack.i.b16 %v2075_v39, %v2071_v34  ;;  %v2129_v52 = vpack.i.b16 %v2083_v42, %v2079_v40 }
 0x196   : > { %v2344_v5 = vrot.slane %v2123_v60, %v4588_v23  ;;  %v2352_v6 = vrot.slane %v2129_v52, %v4588_v23 }
 0x198   : > { %2665 = vrot.lane.b32.xlu0 %v4226_v63, %s5369_s29  ;;  %v2132_v63 = vpack.i.b16 %v2131_v54, %v2130_v53 }
 0x19a   : > { %v2386_v10 = vrot.slane %v2132_v63, %v4588_v23 }
 0x1b4   : > { %v1183_v0 = vpop.f32.mrb[0].mxu0 }
 0x1b5   : > { %v4297_v11 = vpop.f32.mrb[1].mxu0 }
 0x1b6   : > { %v1186_v1 = vpop.f32.mrb[2].mxu0 }
 0x1b7   : > { %v4298_v19 = vpop.f32.mrb[3].mxu0  ;;  %v2276_v1 = vrot.slane %v2111_v56, %v4588_v23 }
 0x1b8   : > { %v2284_v19 = vrot.slane %v2117_v57, %v4588_v23 }
 0x1ba   : > { %v2285_v28 = vcombine.low %v2276_v1, %v2284_v19  ;;  %v2286_v41 = vcombine.high %v2276_v1, %v2284_v19 }
 0x1fe   : > { %v1995_v38 = vpop.permute.xlu0 %1994  ;;  %v1992_v47 = vpop.permute.xlu1 %1991 }
 0x1ff   : > { %v2000_v61 = vcombine.low %v4975_v49, %v1995_v38  ;;  %v2001_v7 = vcombine.high %v4975_v49, %v1995_v38 }
 0x201   : > { %v2008_v8 = vrot.slane %v2000_v61, %v4588_v23 }
 0x202   : > { %v1998_v17 = vpop.permute.xlu1 %1997  ;;  %v1132_v22 = vpop.permute.xlu0 %1131 }
 0x203   : > { %v1142_v31 = vsel %vm1083_vm1, %v1126_v18, %v1132_v22  ;;  %v2016_v55 = vcombine.low %v1992_v47, %v1998_v17  ;;  %v2353_v18 = vcombine.low %v2344_v5, %v2352_v6  ;;  %v2015_v22 = vrot.slane %v2001_v7, %v4588_v23 }
 0x205   : > { %v2024_v11 = vrot.slane %v2016_v55, %v4588_v23  ;;  %v2361_v35 = vrot.slane %v2353_v18, %v4590_v24 }
 0x206   : > { %v1136_v25 = vpop.permute.xlu1 %1135  ;;  %v1140_v26 = vpop.permute.xlu0 %1139 }
 0x207   : > { %v1143_v33 = vsel %vm1090_vm2, %v1142_v31, %v1136_v25  ;;  %v2033_v13 = vcombine.high %v2008_v8, %v2024_v11  ;;  %v2354_v31 = vcombine.high %v2344_v5, %v2352_v6  ;;  %v2387_v25 = vcombine.low %v2378_v9, %v2386_v10 }
 0x208   : > { %v1144_v43 = vsel %vm1095_vm3, %v1143_v33, %v1140_v26  ;;  %v2388_v26 = vcombine.high %v2378_v9, %v2386_v10  ;;  %v2293_v33 = vrot.slane %v2285_v28, %v4590_v24  ;;  %v2032_v45 = vcombine.low %v2008_v8, %v2024_v11 }
 0x209   : > { %v5005_v30 = vadd.f32 %v1183_v0, %v1144_v43  ;;  %v2017_v0 = vcombine.high %v1992_v47, %v1998_v17  ;;  %v2319_v47 = vcombine.low %v2310_v3, %v2318_v4  ;;  %v2320_v17 = vcombine.high %v2310_v3, %v2318_v4 }
 0x20a   : > { %v2047_v49 = vrot.slane %v2033_v13, %v4590_v24  ;;  %v2300_v43 = vrot.slane %v2286_v41, %v4590_v24  ;;  %v2368_v36 = vrot.slane %v2354_v31, %v4590_v24  ;;  %v2395_v37 = vrot.slane %v2387_v25, %v4590_v24  ;;  %v5094_v27 = vpop.permute.xlu0 %2665 }
 0x20b   : > { %1193 = vrot.lane.b32.xlu1 %v5005_v30, %s5367_s28  ;;  %1190 = vrot.lane.b32.xlu0 %v5005_v30, %s5368_s14  ;;  %v2031_v12 = vrot.slane %v2017_v0, %v4588_v23  ;;  %v2327_v32 = vrot.slane %v2319_v47, %v4590_v24  ;;  %v2334_v34 = vrot.slane %v2320_v17, %v4590_v24  ;;  %s5377_s14 = smov 112  }
 0x20c   : > { %v2402_v39 = vrot.slane %v2388_v26, %v4590_v24  ;;  %v2876_v40 = vpack.c.bf16 %v2047_v49, %v2047_v49  ;;  %v2505_v46 = vcombine.low %v2293_v33, %v2300_v43  ;;  %v4220_v48 = vcombine.high %v2293_v33, %v2300_v43 }
 0x20d   : > { %v2048_v38 = vcombine.low %v2015_v22, %v2031_v12  ;;  %v2049_v44 = vcombine.high %v2015_v22, %v2031_v12  ;;  %v2530_v50 = vcombine.low %v2327_v32, %v2334_v34  ;;  %v4221_v51 = vcombine.high %v2327_v32, %v2334_v34 }
 0x20e   : > { %v2555_v53 = vcombine.low %v2361_v35, %v2368_v36  ;;  %v4222_v54 = vcombine.high %v2361_v35, %v2368_v36  ;;  %v2580_v55 = vcombine.low %v2395_v37, %v2402_v39  ;;  %v4223_v56 = vcombine.high %v2395_v37, %v2402_v39 }
 0x20f   : > { %1196 = vrot.lane.b32.xlu1 %v5005_v30, %s5371_s15  ;;  %v2056_v42 = vrot.slane %v2048_v38, %v4590_v24  ;;  %v2063_v58 = vrot.slane %v2049_v44, %v4590_v24  ;;  %v2040_v59 = vrot.slane %v2032_v45, %v4590_v24  ;;  %v2512_v60 = vrot.slane %v2505_v46, %v4588_v23  ;;  %s5378_s15 = smov 104  }
 0x210   : > { %v2520_v52 = vrot.slane %v4220_v48, %v4588_v23  ;;  %v2537_v61 = vrot.slane %v2530_v50, %v4588_v23  ;;  %v2545_v62 = vrot.slane %v4221_v51, %v4588_v23  ;;  %v2562_v63 = vrot.slane %v2555_v53, %v4588_v23 }
 0x211   : > { %v2878_v57 = vpack.c.bf16 %v2056_v42, %v2056_v42  ;;  %v2570_v0 = vrot.slane %v4222_v54, %v4588_v23  ;;  %v2587_v11 = vrot.slane %v2580_v55, %v4588_v23  ;;  %v2595_v1 = vrot.slane %v4223_v56, %v4588_v23 }
 0x212   : > { %v2880_v19 = vpack.c.bf16 %v2063_v58, %v2063_v58  ;;  %v2064_v3 = vcombine.high %v2040_v59, %v4473_v21  ;;  %v2874_v4 = vpack.c.bf16 %v2040_v59, %v2040_v59  ;;  %v2065_v5 = vcombine.high %v2047_v49, %v4473_v21 }
 0x213   : > { %v2521_v6 = vcombine.low %v2512_v60, %v2520_v52  ;;  %v2546_v7 = vcombine.low %v2537_v61, %v2545_v62  ;;  %v2571_v8 = vcombine.low %v2562_v63, %v2570_v0  ;;  %v2596_v9 = vcombine.low %v2587_v11, %v2595_v1 }
 0x214   : > { %v2875_v10 = vpack.c.bf16 %v2064_v3, %v2064_v3  ;;  %v2877_v12 = vpack.c.bf16 %v2065_v5, %v2065_v5  ;;  %v2066_v13 = vcombine.high %v2056_v42, %v4473_v21  ;;  %v2067_v25 = vcombine.high %v2063_v58, %v4473_v21 }
 0x215   : > { %v2528_v28 = vrot.slane %v2521_v6, %v4590_v24  ;;  %v2553_v41 = vrot.slane %v2546_v7, %v4590_v24  ;;  %v2578_v47 = vrot.slane %v2571_v8, %v4590_v24  ;;  %v2603_v17 = vrot.slane %v2596_v9, %v4590_v24 }
 0x216   : > { %v2879_v31 = vpack.c.bf16 %v2066_v13, %v2066_v13  ;;  %v2881_v36 = vpack.c.bf16 %v2067_v25, %v2067_v25 }
 0x217   : > { %v2529_v18 = vcombine.high %v2528_v28, %v4471_v29  ;;  %v2554_v22 = vcombine.high %v2553_v41, %v4471_v29  ;;  %v2579_v26 = vcombine.high %v2578_v47, %v4471_v29  ;;  %v2604_v49 = vcombine.high %v2603_v17, %v4471_v29 }
 0x218   : > { %v2632_v38 = vshrl.u32 %v2528_v28, 16  ;;  %v2633_v33 = vshrl.u32 %v2553_v41, 16  ;;  %v2644_v43 = vshrl.u32 %v2578_v47, 16  ;;  %v2645_v32 = vshrl.u32 %v2603_v17, 16 }
 0x219   : > { %v2637_v34 = vpack.i.b16 %v2554_v22, %v2529_v18  ;;  %v2649_v35 = vpack.i.b16 %v2604_v49, %v2579_v26  ;;  %v2639_v42 = vshrl.u32 %v2554_v22, 16  ;;  %v2650_v44 = vshrl.u32 %v2579_v26, 16 }
 0x21a   : > { %v2634_v37 = vpack.i.b16 %v2633_v33, %v2632_v38  ;;  %v2646_v39 = vpack.i.b16 %v2645_v32, %v2644_v43  ;;  %v2651_v45 = vshrl.u32 %v2604_v49, 16  ;;  %v2631_v48 = vpack.i.b16 %v2553_v41, %v2528_v28 }
 0x21b   : > { %v4229_v46 = vcombine.low %v2637_v34, %v2649_v35  ;;  %v2643_v50 = vpack.i.b16 %v2603_v17, %v2578_v47 }
 0x21c   : > { %v4227_v53 = vcombine.low %v2634_v37, %v2646_v39  ;;  %v2652_v55 = vpack.i.b16 %v2651_v45, %v2650_v44 }
 0x21d   : > { %v5087_v51 = vcombine.low %v2631_v48, %v2643_v50 }
 0x229   : > { %2976 = vxpose.xlu0.c.b16.start.end [1/1] (short) (narrow) %v2876_v40, 16  ;;  %v2638_v40 = vshrl.u32 %v2529_v18, 16 }
 0x22b   : > { %v2640_v54 = vpack.i.b16 %v2639_v42, %v2638_v40 }
 0x22d   : > { %3008 = vxpose.xlu0.c.b16.start.end [1/1] (short) (narrow) %v2878_v57, 16  ;;  %v4231_v20 = vcombine.low %v2640_v54, %v2652_v55 }
 0x231   : > { %3040 = vxpose.xlu0.c.b16.start.end [1/1] (short) (narrow) %v2880_v19, 16 }
 0x232   : > { %2944 = vxpose.xlu1.c.b16.start.end [1/1] (short) (narrow) %v2874_v4, 16 }
 0x235   : > { %2960 = vxpose.xlu0.c.b16.start.end [1/1] (short) (narrow) %v2875_v10, 16 }
 0x236   : > { %2992 = vxpose.xlu1.c.b16.start.end [1/1] (short) (narrow) %v2877_v12, 16 }
 0x23a   : > { %3024 = vxpose.xlu1.c.b16.start.end [1/1] (short) (narrow) %v2879_v31, 16 }
 0x23e   : > { %3056 = vxpose.xlu1.c.b16.start.end [1/1] (short) (narrow) %v2881_v36, 16  ;;  %2685 = vrot.lane.b32.xlu0 %v4230_v15, %s5375_s21 }
 0x242   : > { %2675 = vrot.lane.b32.xlu1 %v4992_v14, %s5374_s16  ;;  %2677 = vrot.lane.b32.xlu0 %v4229_v46, %s5374_s16 }
 0x246   : > { %2667 = vrot.lane.b32.xlu1 %v4227_v53, %s5376_s0 }
 0x24a   : > { %2687 = vrot.lane.b32.xlu1 %v4231_v20, %s5375_s21 }
 0x27d   : > { %v1194_v15 = vpop.permute.xlu1 %1193  ;;  %v1191_v58 = vpop.permute.xlu0 %1190 }
 0x27e   : > { %v1199_v56 = vcombine.low %v5005_v30, %v1194_v15  ;;  %v1200_v57 = vcombine.high %v5005_v30, %v1194_v15 }
 0x280   : > { %v1207_v52 = vrot.slane %v1199_v56, %v4588_v23  ;;  %v1214_v61 = vrot.slane %v1200_v57, %v4588_v23 }
 0x281   : > { %v1197_v59 = vpop.permute.xlu1 %1196 }
 0x282   : > { %v1215_v14 = vcombine.low %v1191_v58, %v1197_v59  ;;  %v1216_v60 = vcombine.high %v1191_v58, %v1197_v59 }
 0x284   : > { %v1223_v62 = vrot.slane %v1215_v14, %v4588_v23  ;;  %v1230_v63 = vrot.slane %v1216_v60, %v4588_v23 }
 0x286   : > { %v1231_v0 = vcombine.low %v1207_v52, %v1223_v62  ;;  %v1232_v11 = vcombine.high %v1207_v52, %v1223_v62  ;;  %v1247_v1 = vcombine.low %v1214_v61, %v1230_v63  ;;  %v1248_v19 = vcombine.high %v1214_v61, %v1230_v63 }
 0x288   : > { %v1239_v3 = vrot.slane %v1231_v0, %v4590_v24  ;;  %v1246_v30 = vrot.slane %v1232_v11, %v4590_v24  ;;  %v1255_v4 = vrot.slane %v1247_v1, %v4590_v24  ;;  %v1262_v5 = vrot.slane %v1248_v19, %v4590_v24 }
 0x28a   : > { %v1263_v6 = vcombine.high %v1239_v3, %v4473_v21  ;;  %v1264_v7 = vcombine.high %v1246_v30, %v4473_v21  ;;  %v1265_v8 = vcombine.high %v1255_v4, %v4473_v21  ;;  %v1266_v9 = vcombine.high %v1262_v5, %v4473_v21 }
 0x28b   : > { %v4233_v10 = vpack.c.bf16 %v1255_v4, %v1239_v3  ;;  %v4234_v12 = vpack.c.bf16 %v1262_v5, %v1246_v30 }
 0x28c   : > { %v4235_v13 = vpack.c.bf16 %v1265_v8, %v1263_v6  ;;  %v4236_v28 = vpack.c.bf16 %v1266_v9, %v1264_v7 }
 0x28d   : > { %v2889_v41 = vrot.slane %v4233_v10, %v4588_v23  ;;  %v2897_v47 = vrot.slane %v4234_v12, %v4588_v23 }
 0x28e   : > { %v2914_v17 = vrot.slane %v4235_v13, %v4588_v23  ;;  %v2922_v18 = vrot.slane %v4236_v28, %v4588_v23  ;;  %v2691_v28 = vsel %vm1083_vm1, %v5000_v16, %v5094_v27 }
 0x28f   : > { %v2898_v22 = vcombine.low %v2889_v41, %v2897_v47  ;;  %v2984_v25 = vpop.trf.xlu0 }
 0x290   : > { %v2923_v31 = vcombine.low %v2914_v17, %v2922_v18 }
 0x291   : > { %v5115_v26 = vrot.slane %v2898_v22, %v4590_v24 }
 0x292   : > { %v5118_v49 = vrot.slane %v2923_v31, %v4590_v24 }
 0x293   : > { %v5122_v38 = vcombine.high %v5115_v26, %v4471_v29  ;;  %v2935_v43 = vshrl.u32 %v5115_v26, 16  ;;  %v3016_v35 = vpop.trf.xlu0 }
 0x294   : > { %v2934_v33 = vpack.i.b16 %v5118_v49, %v5115_v26  ;;  %v2936_v32 = vshrl.u32 %v5118_v49, 16  ;;  %v5130_v34 = vcombine.high %v5118_v49, %v4471_v29 }
 0x295   : > { %v2941_v39 = vshrl.u32 %v5122_v38, 16 }
 0x296   : > { %v5132_v36 = vpack.i.b16 %v2936_v32, %v2935_v43  ;;  %v2940_v37 = vpack.i.b16 %v5130_v34, %v5122_v38  ;;  %v2942_v40 = vshrl.u32 %v5130_v34, 16 }
 0x297   : > { %v3048_v45 = vpop.trf.xlu0 }
 0x298   : > { %v2952_v42 = vpop.trf.xlu1  ;;  %v5138_v44 = vpack.i.b16 %v2942_v40, %v2941_v39  ;;  %v3080_v50 = vcombine.low %v2984_v25, %v3048_v45 }
 0x299   : > { %v3072_v48 = vcombine.low %v2952_v42, %v3016_v35 }
 0x29a   : > { %v3087_v20 = vrot.slane %v3080_v50, %v4588_v23 }
 0x29b   : > { %v2968_v54 = vpop.trf.xlu0  ;;  %v3079_v55 = vrot.slane %v3072_v48, %v4588_v23  ;;  %v4424_v48 = vld [vmem:[%s5357_s7] ss:$0 sps:$4 sm:$0xff]  }
 0x29c   : > { %v3000_v46 = vpop.trf.xlu1 }
 0x29d   : > { %v3088_v58 = vcombine.low %v3079_v55, %v3087_v20  ;;  %v3089_v59 = vcombine.high %v3079_v55, %v3087_v20 }
 0x29f   : > { %v3096_v62 = vrot.slane %v3088_v58, %v4590_v24  ;;  %v3103_v63 = vrot.slane %v3089_v59, %v4590_v24 }
 0x2a0   : > { %v3032_v53 = vpop.trf.xlu1 }
 0x2a1   : > { %v3106_v15 = vcombine.low %v2968_v54, %v3032_v53  ;;  %v3144_v4 = vshrl.u32 %v3096_v62, 16  ;;  %v3104_v5 = vcombine.high %v3096_v62, %v4471_v29  ;;  %v3105_v12 = vcombine.high %v3103_v63, %v4471_v29 }
 0x2a2   : > { %v3160_v13 = vshrl.u32 %v3103_v63, 16 }
 0x2a3   : > { %v3113_v14 = vrot.slane %v3106_v15, %v4588_v23  ;;  %v3152_v25 = vshrl.u32 %v3104_v5, 16  ;;  %v3168_v27 = vshrl.u32 %v3105_v12, 16 }
 0x2a4   : > { %v3064_v56 = vpop.trf.xlu1 }
 0x2a5   : > { %v3114_v57 = vcombine.low %v3000_v46, %v3064_v56 }
 0x2a7   : > { %v3121_v60 = vrot.slane %v3114_v57, %v4588_v23 }
 0x2a9   : > { %v3122_v52 = vcombine.low %v3113_v14, %v3121_v60  ;;  %v3123_v61 = vcombine.high %v3113_v14, %v3121_v60 }
 0x2ab   : > { %v3130_v0 = vrot.slane %v3122_v52, %v4590_v24  ;;  %v3137_v11 = vrot.slane %v3123_v61, %v4590_v24 }
 0x2ad   : > { %v3158_v1 = vpack.i.b16 %v3137_v11, %v3103_v63  ;;  %v3142_v19 = vpack.i.b16 %v3130_v0, %v3096_v62  ;;  %v3145_v3 = vshrl.u32 %v3130_v0, 16  ;;  %v3138_v30 = vcombine.high %v3130_v0, %v4471_v29 }
 0x2ae   : > { %v3139_v8 = vcombine.high %v3137_v11, %v4471_v29  ;;  %v3161_v9 = vshrl.u32 %v3137_v11, 16 }
 0x2af   : > { %3236 = vxpose.xlu1.c.b16.start.end [1/1] (short) (narrow) %v3158_v1, 16  ;;  %3172 = vxpose.xlu0.c.b16.start.end [1/1] (short) (narrow) %v3142_v19, 16  ;;  %v3146_v6 = vpack.i.b16 %v3145_v3, %v3144_v4  ;;  %v3150_v7 = vpack.i.b16 %v3138_v30, %v3104_v5  ;;  %v3153_v22 = vshrl.u32 %v3138_v30, 16 }
 0x2b0   : > { %v2686_v10 = vpop.permute.xlu0 %2685  ;;  %v3166_v17 = vpack.i.b16 %v3139_v8, %v3105_v12  ;;  %v3162_v18 = vpack.i.b16 %v3161_v9, %v3160_v13  ;;  %v3169_v39 = vshrl.u32 %v3139_v8, 16 }
 0x2b1   : > { %v3154_v35 = vpack.i.b16 %v3153_v22, %v3152_v25 }
 0x2b2   : > { %v3170_v45 = vpack.i.b16 %v3169_v39, %v3168_v27 }
 0x2b3   : > { %3188 = vxpose.xlu1.c.b16.start.end [1/1] (short) (narrow) %v3146_v6, 16  ;;  %3204 = vxpose.xlu0.c.b16.start.end [1/1] (short) (narrow) %v3150_v7, 16 }
 0x2b4   : > { %v2676_v41 = vpop.permute.xlu1 %2675  ;;  %v2678_v43 = vpop.permute.xlu0 %2677 }
 0x2b5   : > { %v2696_v47 = vsel %vm1090_vm2, %v2691_v28, %v2676_v41 }
 0x2b6   : > { %v2700_v31 = vsel %vm1095_vm3, %v2696_v47, %v2686_v10 }
 0x2b7   : > { %3268 = vxpose.xlu1.c.b16.start.end [1/1] (short) (narrow) %v3166_v17, 16  ;;  %3252 = vxpose.xlu0.c.b16.start.end [1/1] (short) (narrow) %v3162_v18, 16 }
 0x2b8   : > { %4308 = vmatpush3.bf16.msra.mxu0 %v2700_v31  ;;  %v2668_v32 = vpop.permute.xlu1 %2667 }
 0x2b9   : > { %v2694_v40 = vsel %vm1083_vm1, %v5087_v51, %v2668_v32  ;;  %4309 = vmatprep.subr.bf16.mxu0 %v4473_v21  ;;  %v5167_v51 = vrot.slane %v4424_v48, %v4588_v23 }
 0x2ba   : > { %v2698_v16 = vsel %vm1090_vm2, %v2694_v40, %v2678_v43 }
 0x2bb   : > { %3220 = vxpose.xlu0.c.b16.start.end [1/1] (short) (narrow) %v3154_v35, 16  ;;  %v2713_v50 = vcombine.low %v5167_v51, %v5167_v51 }
 0x2bc   : > { %v2688_v42 = vpop.permute.xlu1 %2687 }
 0x2bd   : > { %v2703_v46 = vsel %vm1095_vm3, %v2698_v16, %v2688_v42  ;;  %v5176_v53 = vrot.slane %v2713_v50, %v4590_v24 }
 0x2be   : > { %4310 = vmatpush3.bf16.msra.mxu0 %v2703_v46 }
 0x2bf   : > { %3284 = vxpose.xlu0.c.b16.start.end [1/1] (short) (narrow) %v3170_v45, 16  ;;  %4321 = vmatprep.subr.bf16.mxu0 %v4473_v21  ;;  %v2730_v54 = vcombine.high %v5176_v53, %v5176_v53 }
 0x2c1   : > { %4312 = vmatmul.mubr.msk.bf16.vlgmr.msra.gmra.mrb[4].mxu0 %vm1145_vm4, %v4888_v2  ;;  %2734 = vrot.lane.b32.xlu1 %v2730_v54, %s5376_s0 }
 0x2c2   : > { %4323 = vmatprep.mubr.msk.bf16.mxu0 %vm4475_vm0, %v4473_v21 }
 0x315   : > { %v3244_v55 = vpop.trf.xlu1  ;;  %v3180_v20 = vpop.trf.xlu0 }
 0x316   : > { %v3300_v57 = vcombine.low %v3180_v20, %v3244_v55  ;;  %v2714_v55 = vcombine.high %v5167_v51, %v5167_v51 }
 0x318   : > { %v3307_v60 = vrot.slane %v3300_v57, %v4588_v23  ;;  %v2728_v20 = vrot.slane %v2714_v55, %v4590_v24 }
 0x319   : > { %v3196_v15 = vpop.trf.xlu1  ;;  %v3212_v56 = vpop.trf.xlu0 }
 0x31d   : > { %v3276_v2 = vpop.trf.xlu1  ;;  %v3260_v58 = vpop.trf.xlu0 }
 0x31e   : > { %v3308_v59 = vcombine.low %v3212_v56, %v3276_v2  ;;  %v3325_v62 = vcombine.low %v3196_v15, %v3260_v58  ;;  %v2732_v15 = vcombine.high %v2728_v20, %v2728_v20  ;;  %v2731_v56 = vcombine.low %v2728_v20, %v2728_v20 }
 0x320   : > { %v3315_v14 = vrot.slane %v3308_v59, %v4588_v23  ;;  %v3332_v1 = vrot.slane %v3325_v62, %v4588_v23 }
 0x321   : > { %v3228_v52 = vpop.trf.xlu0 }
 0x322   : > { %v3316_v61 = vcombine.low %v3307_v60, %v3315_v14 }
 0x324   : > { %v3323_v11 = vrot.slane %v3316_v61, %v4590_v24 }
 0x325   : > { %v3292_v63 = vpop.trf.xlu0 }
 0x326   : > { %v3333_v0 = vcombine.low %v3228_v52, %v3292_v63  ;;  %v3324_v30 = vcombine.high %v3323_v11, %v4471_v29  ;;  %v3353_v6 = vshrl.u32 %v3323_v11, 16 }
 0x328   : > { %v3340_v19 = vrot.slane %v3333_v0, %v4588_v23  ;;  %v3359_v9 = vshrl.u32 %v3324_v30, 16 }
 0x32a   : > { %v3341_v3 = vcombine.low %v3332_v1, %v3340_v19 }
 0x32c   : > { %v3348_v4 = vrot.slane %v3341_v3, %v4590_v24 }
 0x32e   : > { %v3352_v5 = vpack.i.b16 %v3348_v4, %v3323_v11  ;;  %v3354_v7 = vshrl.u32 %v3348_v4, 16  ;;  %v3349_v8 = vcombine.high %v3348_v4, %v4471_v29  ;;  %v2729_v11 = vcombine.low %v5176_v53, %v5176_v53 }
 0x330   : > { %v3367_v10 = vsel %vm3365_vm5, %v3352_v5, 0  ;;  %v3355_v12 = vpack.i.b16 %v3354_v7, %v3353_v6  ;;  %v3358_v13 = vpack.i.b16 %v3349_v8, %v3324_v30  ;;  %v3360_v28 = vshrl.u32 %v3349_v8, 16 }
 0x331   : > { %4316 = vmatpush3.bf16.msra.mxu1 %v3367_v10 }
 0x332   : > { %v3413_v41 = vsel %vm3365_vm5, %v3355_v12, 0  ;;  %4327 = vmatprep.subr.bf16.mxu1 %v4473_v21  ;;  %v3361_v47 = vpack.i.b16 %v3360_v28, %v3359_v9  ;;  %v3459_v17 = vsel %vm3365_vm5, %v3358_v13, 0 }
 0x333   : > { %4322 = vmatpush3.bf16.msra.mxu0 %v3413_v41  ;;  %v2735_v57 = vpop.permute.xlu1 %2734 }
 0x334   : > { %4318 = vmatmul.mubr.msk.bf16.vlgmr.msra.gmra.mrb[4].mxu1 %vm1083_vm1, %v2934_v33  ;;  %4333 = vmatprep.subr.bf16.mxu0 %v4473_v21  ;;  %v3505_v18 = vsel %vm3365_vm5, %v3361_v47, 0  ;;  %v2745_v3 = vsel %vm1083_vm1, %v2729_v11, %v2735_v57 }
 0x335   : > { %4328 = vmatpush3.bf16.msra.mxu1 %v3459_v17  ;;  %4329 = vmatprep.mubr.msk.bf16.mxu1 %vm4475_vm0, %v4473_v21 }
 0x336   : > { %4324 = vmatmul.mubr.msk.bf16.vlgmr.msra.gmra.mrb[8].mxu0 %vm1083_vm1, %v5132_v36  ;;  %4339 = vmatprep.subr.bf16.mxu1 %v4473_v21 }
 0x337   : > { %4334 = vmatpush3.bf16.msra.mxu0 %v3505_v18  ;;  %4335 = vmatprep.mubr.msk.bf16.mxu0 %vm4475_vm0, %v4473_v21 }
 0x338   : > { %4345 = vmatprep.subr.bf16.mxu0 %v4473_v21 }
 0x33c   : > { %4330 = vmatmul.mubr.msk.bf16.vlgmr.msra.gmra.mrb[8].mxu1 %vm1083_vm1, %v2940_v37 }
 0x33d   : > { %4341 = vmatprep.mubr.msk.bf16.mxu1 %vm4475_vm0, %v4473_v21 }
 0x33e   : > { %4336 = vmatmul.mubr.msk.bf16.vlgmr.msra.gmra.mrb[12].mxu0 %vm1083_vm1, %v5138_v44 }
 0x33f   : > { %4347 = vmatprep.mubr.msk.bf16.mxu0 %vm4475_vm0, %v4473_v21 }
 0x394   : > { %v2782_v26 = vpop.f32.mrb[4].mxu0 }
 0x395   : > { %v4313_v49 = vpop.f32.mrb[5].mxu0 }
 0x396   : > { %v2785_v33 = vpop.f32.mrb[6].mxu0 }
 0x397   : > { %v4314_v36 = vpop.f32.mrb[7].mxu0 }
 0x407   : > { %v3403_v22 = vpop.f32.mrb[4].mxu1 }
 0x408   : > { %v4319_v31 = vpop.f32.mrb[5].mxu1  ;;  %v3547_v25 = vsel %vm1083_vm1, %v3403_v22, -inf }
 0x409   : > { %3548 = vmax.xlane.f32.xlu1 %v3547_v25  ;;  %v3406_v38 = vpop.f32.mrb[6].mxu1  ;;  %v3449_v34 = vpop.f32.mrb[8].mxu0 }
 0x40a   : > { %v4320_v37 = vpop.f32.mrb[7].mxu1  ;;  %v4325_v43 = vpop.f32.mrb[9].mxu0  ;;  %v3550_v32 = vsel %vm1083_vm1, %v3449_v34, -inf }
 0x40b   : > { %3551 = vmax.xlane.f32.xlu0 %v3550_v32  ;;  %v3452_v44 = vpop.f32.mrb[10].mxu0 }
 0x40c   : > { %v4326_v35 = vpop.f32.mrb[11].mxu0 }
 0x40f   : > { %v3495_v39 = vpop.f32.mrb[8].mxu1 }
 0x410   : > { %v4331_v40 = vpop.f32.mrb[9].mxu1  ;;  %v3553_v16 = vsel %vm1083_vm1, %v3495_v39, -inf }
 0x411   : > { %3554 = vmax.xlane.f32.xlu1 %v3553_v16  ;;  %v3498_v27 = vpop.f32.mrb[10].mxu1  ;;  %v3541_v42 = vpop.f32.mrb[12].mxu0 }
 0x412   : > { %v4332_v45 = vpop.f32.mrb[11].mxu1  ;;  %v4337_v46 = vpop.f32.mrb[13].mxu0  ;;  %v3556_v48 = vsel %vm1083_vm1, %v3541_v42, -inf }
 0x413   : > { %3557 = vmax.xlane.f32.xlu0 %v3556_v48  ;;  %v3544_v50 = vpop.f32.mrb[14].mxu0 }
 0x414   : > { %v4338_v54 = vpop.f32.mrb[15].mxu0 }
 0x422   : > { %2742 = vrot.lane.b32.xlu1 %v2732_v15, %s5375_s21 }
 0x429   : > { %2738 = vrot.lane.b32.xlu0 %v2731_v56, %s5374_s16  ;;  %s5379_s16 = smov 120  }
 0x496   : > { %v3549_v2 = vpop.xlane.xlu1 %3548 }
 0x497   : > { %v3559_v58 = vsub.f32 %v3403_v22, %v3549_v2 }
 0x498   : > { %v3552_v59 = vpop.xlane.xlu0 %3551 }
 0x499   : > { %v3563_v14 = vmul.f32 1.442695, %v3559_v58  ;;  %v3560_v60 = vsub.f32 %v3449_v34, %v3552_v59 }
 0x49b   : > { %4425 = vpow2.f32 %v3563_v14  ;;  %v3565_v52 = vmul.f32 1.442695, %v3560_v60 }
 0x49d   : > { %4427 = vpow2.f32 %v3565_v52 }
 0x49e   : > { %v3555_v1 = vpop.xlane.xlu1 %3554 }
 0x49f   : > { %v3561_v7 = vsub.f32 %v3495_v39, %v3555_v1 }
 0x4a0   : > { %v3558_v63 = vpop.xlane.xlu0 %3557 }
 0x4a1   : > { %v3562_v8 = vsub.f32 %v3541_v42, %v3558_v63  ;;  %v3567_v9 = vmul.f32 1.442695, %v3561_v7 }
 0x4a2   : > { %v2743_v4 = vpop.permute.xlu1 %2742 }
 0x4a3   : > { %v3569_v53 = vmul.f32 1.442695, %v3562_v8  ;;  %4429 = vpow2.f32 %v3567_v9 }
 0x4a4   : > { %v2739_v19 = vpop.permute.xlu0 %2738 }
 0x4a5   : > { %v5226_v61 = vpop.eup %4425  ;;  %v2746_v30 = vsel %vm1090_vm2, %v2745_v3, %v2739_v19  ;;  %4431 = vpow2.f32 %v3569_v53 }
 0x4a6   : > { %v3571_v51 = vsel %vm1083_vm1, %v5226_v61, 0.0  ;;  %v2747_v5 = vsel %vm1095_vm3, %v2746_v30, %v2743_v4 }
 0x4a7   : > { %v5230_v62 = vpop.eup %4427  ;;  %3572 = vadd.xlane.f32.xlu1 %v3571_v51  ;;  %v2783_v6 = vadd.f32 %v2782_v26, %v2747_v5 }
 0x4a8   : > { %v3574_v0 = vsel %vm1083_vm1, %v5230_v62, 0.0 }
 0x4a9   : > { %3575 = vadd.xlane.f32.xlu0 %v3574_v0 }
 0x4ad   : > { %v5242_v10 = vpop.eup %4429 }
 0x4ae   : > { %v3577_v13 = vsel %vm1083_vm1, %v5242_v10, 0.0 }
 0x4af   : > { %v5244_v12 = vpop.eup %4431 }
 0x4b0   : > { %v3580_v28 = vsel %vm1083_vm1, %v5244_v12, 0.0 }
 0x4b8   : > { %2792 = vrot.lane.b32.xlu1 %v2783_v6, %s5377_s14 }
 0x4bc   : > { %2795 = vrot.lane.b32.xlu1 %v2783_v6, %s5378_s15 }
 0x4bf   : > { %2789 = vrot.lane.b32.xlu0 %v2783_v6, %s5379_s16 }
 0x4de   : > { %3578 = vadd.xlane.f32.xlu0 %v3577_v13 }
 0x4e0   : > { %3581 = vadd.xlane.f32.xlu1 %v3580_v28 }
 0x534   : > { %v3573_v41 = vpop.xlane.xlu1 %3572 }
 0x535   : > { %4433 = vrcp.f32 %v3573_v41 }
 0x536   : > { %v3576_v47 = vpop.xlane.xlu0 %3575 }
 0x537   : > { %4435 = vrcp.f32 %v3576_v47 }
 0x538   : > { %v2793_v17 = vpop.permute.xlu1 %2792 }
 0x539   : > { %v2798_v18 = vcombine.low %v2783_v6, %v2793_v17  ;;  %v2799_v26 = vcombine.high %v2783_v6, %v2793_v17 }
 0x53a   : > { %v2790_v49 = vpop.permute.xlu0 %2789 }
 0x53b   : > { %v2806_v31 = vrot.slane %v2798_v18, %v4588_v23  ;;  %v2813_v25 = vrot.slane %v2799_v26, %v4588_v23  ;;  %v3853_v26 = vld [vmem:[%s5358_s8] sm:$0xf] }
 0x53c   : > { %v2796_v33 = vpop.permute.xlu1 %2795 }
 0x53d   : > { %v2814_v36 = vcombine.low %v2790_v49, %v2796_v33  ;;  %v2815_v22 = vcombine.high %v2790_v49, %v2796_v33  ;;  %v3855_v33 = vld [vmem:[%s5358_s8 + $0x8] sm:$0xf] }
 0x53f   : > { %v2822_v38 = vrot.slane %v2814_v36, %v4588_v23  ;;  %v2829_v34 = vrot.slane %v2815_v22, %v4588_v23  ;;  %v4434_v2 = vpop.eup %4433  ;;  %v3856_v22 = vld [vmem:[%s5358_s8 + $0xc] sm:$0xf] }
 0x540   : > { %v3587_v51 = vmul.f32 %v4434_v2, %v5226_v61 }
 0x541   : > { %v2830_v37 = vcombine.low %v2806_v31, %v2822_v38  ;;  %v2831_v43 = vcombine.high %v2806_v31, %v2822_v38  ;;  %v2846_v32 = vcombine.low %v2813_v25, %v2829_v34  ;;  %v2847_v44 = vcombine.high %v2813_v25, %v2829_v34  ;;  %v4436_v14 = vpop.eup %4435 }
 0x542   : > { %v3588_v3 = vmul.f32 %v4436_v14, %v5230_v62  ;;  %v3591_v7 = vpack.c.bf16 %v3587_v51, %v3587_v51  ;;  %v3953_v38 = vsel %vm3365_vm5, %v3855_v33, 0 }
 0x543   : > { %v2838_v35 = vrot.slane %v2830_v37, %v4590_v24  ;;  %v2845_v39 = vrot.slane %v2831_v43, %v4590_v24  ;;  %v2854_v40 = vrot.slane %v2846_v32, %v4590_v24  ;;  %v2861_v16 = vrot.slane %v2847_v44, %v4590_v24 }
 0x544   : > { %v3592_v8 = vpack.c.bf16 %v3588_v3, %v3588_v3 }
 0x545   : > { %v2862_v27 = vcombine.high %v2838_v35, %v4473_v21  ;;  %v2863_v42 = vcombine.high %v2845_v39, %v4473_v21  ;;  %v2864_v45 = vcombine.high %v2854_v40, %v4473_v21  ;;  %v2865_v46 = vcombine.high %v2861_v16, %v4473_v21 }
 0x546   : > { %v4241_v48 = vpack.c.bf16 %v2854_v40, %v2838_v35  ;;  %v4242_v50 = vpack.c.bf16 %v2861_v16, %v2845_v39  ;;  %v3999_v35 = vsel %vm3365_vm5, %v3856_v22, 0 }
 0x547   : > { %v4243_v54 = vpack.c.bf16 %v2864_v45, %v2862_v27  ;;  %v4244_v55 = vpack.c.bf16 %v2865_v46, %v2863_v42 }
 0x548   : > { %v3610_v20 = vrot.slane %v4241_v48, %v4588_v23  ;;  %v3618_v15 = vrot.slane %v4242_v50, %v4588_v23 }
 0x549   : > { %v3635_v56 = vrot.slane %v4243_v54, %v4588_v23  ;;  %v3643_v57 = vrot.slane %v4244_v55, %v4588_v23 }
 0x54a   : > { %v3619_v58 = vcombine.low %v3610_v20, %v3618_v15 }
 0x54b   : > { %v3644_v59 = vcombine.low %v3635_v56, %v3643_v57 }
 0x54c   : > { %v3626_v60 = vrot.slane %v3619_v58, %v4590_v24 }
 0x54d   : > { %v3651_v52 = vrot.slane %v3644_v59, %v4590_v24 }
 0x54e   : > { %v3627_v63 = vcombine.high %v3626_v60, %v4471_v29  ;;  %v3656_v11 = vshrl.u32 %v3626_v60, 16 }
 0x54f   : > { %v3655_v0 = vpack.i.b16 %v3651_v52, %v3626_v60  ;;  %v3657_v1 = vshrl.u32 %v3651_v52, 16  ;;  %v3652_v19 = vcombine.high %v3651_v52, %v4471_v29 }
 0x550   : > { %v3662_v23 = vshrl.u32 %v3627_v63, 16 }
 0x551   : > { %v3669_v30 = vsel %vm3365_vm5, %v3655_v0, 0  ;;  %v3658_v4 = vpack.i.b16 %v3657_v1, %v3656_v11  ;;  %v3661_v5 = vpack.i.b16 %v3652_v19, %v3627_v63  ;;  %v3663_v6 = vshrl.u32 %v3652_v19, 16 }
 0x552   : > { %4340 = vmatpush3.bf16.msra.mxu1 %v3669_v30  ;;  %v4253_v30 = vld [vmem:[%s5359_s9] ss:$0 sm:$0xff] }
 0x553   : > { %v3715_v24 = vsel %vm3365_vm5, %v3658_v4, 0  ;;  %4351 = vmatprep.subr.bf16.mxu1 %v4473_v21  ;;  %v3664_v61 = vpack.i.b16 %v3663_v6, %v3662_v23  ;;  %v3761_v29 = vsel %vm3365_vm5, %v3661_v5, 0 }
 0x554   : > { %4346 = vmatpush3.bf16.msra.mxu0 %v3715_v24 }
 0x555   : > { %4342 = vmatmul.mubr.msk.bf16.vlgmr.msra.gmra.mrb[12].mxu1 %vm1083_vm1, %v3591_v7  ;;  %4357 = vmatprep.subr.bf16.mxu0 %v4473_v21  ;;  %v3807_v62 = vsel %vm3365_vm5, %v3664_v61, 0 }
 0x556   : > { %4352 = vmatpush3.bf16.msra.mxu1 %v3761_v29  ;;  %4353 = vmatprep.mubr.msk.bf16.mxu1 %vm4475_vm0, %v4473_v21  ;;  %v4443_v29 = vld [vmem:[%s4903_s19] sm:$0xff] }
 0x557   : > { %4348 = vmatmul.mubr.msk.bf16.vlgmr.msra.gmra.mrb[16].mxu0 %vm1083_vm1, %v3592_v8  ;;  %4363 = vmatprep.subr.bf16.mxu1 %v4473_v21 }
 0x558   : > { %4358 = vmatpush3.bf16.msra.mxu0 %v3807_v62  ;;  %4359 = vmatprep.mubr.msk.bf16.mxu0 %vm4475_vm0, %v4473_v21 }
 0x559   : > { %4369 = vmatprep.subr.bf16.mxu0 %v4473_v21 }
 0x56b   : > { %v3579_v9 = vpop.xlane.xlu0 %3578 }
 0x56c   : > { %4437 = vrcp.f32 %v3579_v9 }
 0x56d   : > { %v3582_v53 = vpop.xlane.xlu1 %3581 }
 0x56e   : > { %4439 = vrcp.f32 %v3582_v53 }
 0x576   : > { %v4438_v13 = vpop.eup %4437 }
 0x577   : > { %v3589_v28 = vmul.f32 %v4438_v13, %v5242_v10  ;;  %v3861_v10 = vsel %vm3365_vm5, %v3853_v26, 0 }
 0x578   : > { %v4440_v41 = vpop.eup %4439 }
 0x579   : > { %v3590_v47 = vmul.f32 %v4440_v41, %v5244_v12  ;;  %v3593_v17 = vpack.c.bf16 %v3589_v28, %v3589_v28  ;;  %v3854_v12 = vld [vmem:[%s5358_s8 + $0x4] sm:$0xf] }
 0x57a   : > { %v3907_v49 = vsel %vm3365_vm5, %v3854_v12, 0 }
 0x57b   : > { %v3594_v18 = vpack.c.bf16 %v3590_v47, %v3590_v47  ;;  %4354 = vmatmul.mubr.msk.bf16.vlgmr.msra.gmra.mrb[16].mxu1 %vm1083_vm1, %v3593_v17 }
 0x57c   : > { %4365 = vmatprep.mubr.msk.bf16.mxu1 %vm4475_vm0, %v4473_v21  ;;  %4364 = vmatpush3.bf16.msra.mxu1 %v3861_v10  ;;  %v4254_v10 = vld [vmem:[%s5360_s10] ss:$0 sm:$0xff] }
 0x57d   : > { %4360 = vmatmul.mubr.msk.bf16.vlgmr.msra.gmra.mrb[20].mxu0 %vm1083_vm1, %v3594_v18  ;;  %4375 = vmatprep.subr.bf16.mxu1 %v4473_v21 }
 0x57e   : > { %4371 = vmatprep.mubr.msk.bf16.mxu0 %vm4475_vm0, %v4473_v21  ;;  %4370 = vmatpush3.bf16.msra.mxu0 %v3907_v49  ;;  %v4255_v49 = vld [vmem:[%s5361_s11] ss:$0 sm:$0xff] }
 0x57f   : > { %4381 = vmatprep.subr.bf16.mxu0 %v4473_v21 }
 0x628   : > { %v3705_v36 = vpop.f32.mrb[12].mxu1 }
 0x629   : > { %v3849_v31 = vpack.c.bf16 %v3705_v36, %v3705_v36  ;;  %v4343_v25 = vpop.f32.mrb[13].mxu1 }
 0x62a   : > { %v3708_v34 = vpop.f32.mrb[14].mxu1  ;;  %v3751_v37 = vpop.f32.mrb[16].mxu0 }
 0x62b   : > { %v3850_v43 = vpack.c.bf16 %v3751_v37, %v3751_v37  ;;  %v4344_v32 = vpop.f32.mrb[15].mxu1  ;;  %v4349_v44 = vpop.f32.mrb[17].mxu0  ;;  %4366 = vmatmul.mubr.msk.bf16.vlgmr.msra.gmra.mrb[20].mxu1 %vm1083_vm1, %v3849_v31 }
 0x62c   : > { %v3754_v39 = vpop.f32.mrb[18].mxu0  ;;  %4376 = vmatpush3.bf16.msra.mxu1 %v3953_v38  ;;  %4377 = vmatprep.mubr.msk.bf16.mxu1 %vm4475_vm0, %v4473_v21 }
 0x62d   : > { %v4350_v40 = vpop.f32.mrb[19].mxu0  ;;  %4372 = vmatmul.mubr.msk.bf16.vlgmr.msra.gmra.mrb[24].mxu0 %vm1083_vm1, %v3850_v43 }
 0x62e   : > { %4382 = vmatpush3.bf16.msra.mxu0 %v3999_v35  ;;  %4383 = vmatprep.mubr.msk.bf16.mxu0 %vm4475_vm0, %v4473_v21 }
 0x64e   : > { %v3797_v16 = vpop.f32.mrb[16].mxu1 }
 0x64f   : > { %v3851_v27 = vpack.c.bf16 %v3797_v16, %v3797_v16  ;;  %v4355_v42 = vpop.f32.mrb[17].mxu1 }
 0x650   : > { %v3800_v45 = vpop.f32.mrb[18].mxu1  ;;  %v3843_v46 = vpop.f32.mrb[20].mxu0 }
 0x651   : > { %v3852_v48 = vpack.c.bf16 %v3843_v46, %v3843_v46  ;;  %v4356_v50 = vpop.f32.mrb[19].mxu1  ;;  %v4361_v54 = vpop.f32.mrb[21].mxu0  ;;  %4378 = vmatmul.mubr.msk.bf16.vlgmr.msra.gmra.mrb[24].mxu1 %vm1083_vm1, %v3851_v27 }
 0x652   : > { %v3846_v55 = vpop.f32.mrb[22].mxu0 }
 0x653   : > { %v4362_v20 = vpop.f32.mrb[23].mxu0  ;;  %4384 = vmatmul.mubr.msk.bf16.vlgmr.msra.gmra.mrb[28].mxu0 %vm1083_vm1, %v3852_v48 }
 0x6fe   : > { %v3897_v15 = vpop.f32.mrb[20].mxu1 }
 0x6ff   : > { %v4367_v56 = vpop.f32.mrb[21].mxu1  ;;  %v4041_v21 = vsel %vm1145_vm4, %v3897_v15, 0.0 }
 0x700   : > { %v3900_v57 = vpop.f32.mrb[22].mxu1  ;;  %v3943_v2 = vpop.f32.mrb[24].mxu0 }
 0x701   : > { %v4042_v58 = vsel %vm1145_vm4, %v3943_v2, 0.0  ;;  %v4368_v59 = vpop.f32.mrb[23].mxu1  ;;  %v4373_v14 = vpop.f32.mrb[25].mxu0 }
 0x702   : > { %v4043_v60 = vadd.f32 %v4042_v58, %v4041_v21  ;;  %v3946_v52 = vpop.f32.mrb[26].mxu0 }
 0x703   : > { %v4374_v51 = vpop.f32.mrb[27].mxu0 }
 0x724   : > { %v3989_v63 = vpop.f32.mrb[24].mxu1 }
 0x725   : > { %v4044_v0 = vsel %vm1145_vm4, %v3989_v63, 0.0  ;;  %v4379_v11 = vpop.f32.mrb[25].mxu1 }
 0x726   : > { %v4045_v1 = vadd.f32 %v4044_v0, %v4043_v60  ;;  %v3992_v19 = vpop.f32.mrb[26].mxu1  ;;  %v4035_v3 = vpop.f32.mrb[28].mxu0 }
 0x727   : > { %v4046_v23 = vsel %vm1145_vm4, %v4035_v3, 0.0  ;;  %v4380_v4 = vpop.f32.mrb[27].mxu1  ;;  %v4385_v5 = vpop.f32.mrb[29].mxu0 }
 0x728   : > { %v4047_v6 = vadd.f32 %v4046_v23, %v4045_v1  ;;  %v4038_v24 = vpop.f32.mrb[30].mxu0 }
 0x729   : > { %v4386_v7 = vpop.f32.mrb[31].mxu0 }
 0x72a   : > { %v4055_v61 = vadd.f32 %v4253_v30, %v4047_v6 }
 0x72c   : > { %v4056_v8 = vadd.f32 %v4443_v29, %v4055_v61 }
 0x72e   : > { %v4059_v62 = vsel %vm1145_vm4, %v4056_v8, 0.0 }
 0x72f   : > { %4060 = vadd.xlane.f32.xlu0 %v4059_v62 }
 0x7bc   : > { %v4061_v9 = vpop.xlane.xlu0 %4060 }
 0x7bd   : > { %v4063_v53 = vmul.f32 0.03125, %v4061_v9 }
 0x7bf   : > { %v4064_v13 = vsub.f32 %v4056_v8, %v4063_v53 }
 0x7c1   : > { %v4065_v28 = vmul.f32 %v4064_v13, %v4064_v13 }
 0x7c3   : > { %v4066_v41 = vsel %vm1145_vm4, %v4065_v28, 0.0 }
 0x7c4   : > { %4067 = vadd.xlane.f32.xlu0 %v4066_v41 }
 0x851   : > { %v4068_v47 = vpop.xlane.xlu0 %4067 }
 0x852   : > { %v4069_v17 = vmul.f32 0.03125, %v4068_v47 }
 0x854   : > { %v4070_v18 = vadd.f32 1e-05, %v4069_v17 }
 0x856   : > { %4441 = vrsqrt.f32 %v4070_v18 }
 0x860   : > { %v4442_v26 = vpop.eup %4441 }
 0x861   : > { %v4072_v12 = vmul.f32 %v4442_v26, %v4064_v13 }
 0x863   : > { %v4079_v33 = vmul.f32 %v4254_v10, %v4072_v12 }
 0x865   : > { %v4086_v36 = vadd.f32 %v4255_v49, %v4079_v33 }
 0x867   : > { %4087 = vst.msk [vmem:[%s456_s27] sm:$0xff] %vm1145_vm4, %v4086_v36 }
 0x868 PF: > { %s22_s23 = sadd.s32 1, %s4466_s23   ;;  %s5380_s21 = smov %s4462_s22 }
 0x869   : > { %p19_p5 = scmp.ge.s32.totalorder %s22_s23, 4   ;;  %s5381_s22 = smov %s5383_s24 }
 0x86b   :  { %21 = sbr.rel (!%p19_p5) target bundleno = 2 (0x2), region = 101 }

</bundles_post_ra>
